<compile_context>
chip_gen: v5e
topology: v5e:2x2
jax: 0.10.0
libtpu: 0.0.40
codegen_flags: <defaults>
</compile_context>

<pallas_src>
import math

import jax
import jax.numpy as jnp
from jax import lax
from jax.experimental import pallas as pl
from jax.experimental.pallas import tpu as pltpu

# ----------------------------- configuration ------------------------------
BATCH = 2
SEQ = 8
HIDDEN = 32
NUM_HEADS = 4
HEAD_DIM = HIDDEN // NUM_HEADS
FFN = 4 * HIDDEN
DEPTH = 2
LN_EPS = 1e-5

PARAM_ORDER = (
    "ln1_w", "ln1_b", "wqkv", "bqkv", "wo", "bo",
    "ln2_w", "ln2_b", "w1", "b1", "w2", "b2",
)


# ------------------------------ Pallas kernel ------------------------------
def _decoder_stack_kernel(
    x_ref,        # (1, S, H)          this batch's hidden states
    mask_ref,     # (1, NH*S, NH*S)    additive attention bias (head block-diag)
    ln1w_ref, ln1b_ref,                # (D, 1, H)          f32
    wqkv_ref, bqkv_ref,                # (D, H, 3H) bf16,   (D, 1, 3H) f32
    wo_ref, bo_ref,                    # (D, H, H)  bf16,   (D, 1, H)  f32
    ln2w_ref, ln2b_ref,                # (D, 1, H)          f32
    w1_ref, b1_ref,                    # (D, H, FFN) bf16,  (D, 1, FFN) f32
    w2_ref, b2_ref,                    # (D, FFN, H) bf16,  (D, 1, H)  f32
    out_ref,      # (1, S, H)
    qp_ref,       # VMEM (NH*S, HD) f32   packed Q
    kp_ref,       # VMEM (NH*S, HD) f32   packed K
    vp_ref,       # VMEM (NH*S, HD) f32   packed V
    ctx_ref,      # VMEM (S, H)     f32   reassembled attention context
):
    seq = x_ref.shape[1]
    hid = x_ref.shape[2]
    num_heads = NUM_HEADS
    head_dim = hid // num_heads
    depth = ln1w_ref.shape[0]

    scale = jnp.float32(1.0 / math.sqrt(head_dim))
    bias = mask_ref[0]                       # (NH*S, NH*S) f32, stays f32
    h = x_ref[0].astype(jnp.float32)         # (S, H) resident in vregs

    for d in range(depth):                   # static, fully unrolled depth loop
        x = h

        # ---- LayerNorm 1 (f32) ----
        mu = jnp.mean(x, axis=-1, keepdims=True)
        var = jnp.mean((x - mu) ** 2, axis=-1, keepdims=True)
        xn = (x - mu) * lax.rsqrt(var + LN_EPS)
        xn = xn * ln1w_ref[d] + ln1b_ref[d]

        # ---- fused QKV projection (1 MXU push; weights pre-cast to bf16) ----
        qkv = jnp.dot(
            xn.astype(jnp.bfloat16), wqkv_ref[d],
            preferred_element_type=jnp.float32,
        ) + bqkv_ref[d]                      # (S, 3H) f32

        # ---- pack heads onto the sublane axis: (S, NH*HD) -> (NH*S, HD) ----
        # (static sub-tile stores into VMEM scratch; softmax scale folded
        #  into Q before the bf16 cast)
        for hh in range(num_heads):
            lo = hh * head_dim
            rows = slice(hh * seq, (hh + 1) * seq)
            qp_ref[rows, :] = qkv[:, lo:lo + head_dim] * scale
            kp_ref[rows, :] = qkv[:, hid + lo:hid + lo + head_dim]
            vp_ref[rows, :] = qkv[:, 2 * hid + lo:2 * hid + lo + head_dim]

        qp = qp_ref[...].astype(jnp.bfloat16)
        kp = kp_ref[...].astype(jnp.bfloat16)
        vp = vp_ref[...].astype(jnp.bfloat16)

        # ---- single packed-head score matmul (cross-head scores masked) ----
        s = lax.dot_general(
            qp, kp,
            dimension_numbers=(((1,), (1,)), ((), ())),
            preferred_element_type=jnp.float32,
        ) + bias                             # (NH*S, NH*S) f32

        # ---- one softmax for all heads; normalize after the PV matmul ----
        m = jnp.max(s, axis=-1, keepdims=True)
        p = jnp.exp(s - m)
        denom = jnp.sum(p, axis=-1, keepdims=True)

        ov = jnp.dot(
            p.astype(jnp.bfloat16), vp,
            preferred_element_type=jnp.float32,
        )                                    # (NH*S, HD) f32
        ov = ov * pl.reciprocal(denom, approx=True)

        # ---- unpack back to (S, H) and do ONE output-projection matmul ----
        for hh in range(num_heads):
            lo = hh * head_dim
            ctx_ref[:, lo:lo + head_dim] = ov[hh * seq:(hh + 1) * seq, :]
        attn = jnp.dot(
            ctx_ref[...].astype(jnp.bfloat16), wo_ref[d],
            preferred_element_type=jnp.float32,
        ) + bo_ref[d]                        # (S, H) f32

        h1 = x + attn                        # residual (f32)

        # ---- LayerNorm 2 (f32) ----
        mu2 = jnp.mean(h1, axis=-1, keepdims=True)
        var2 = jnp.mean((h1 - mu2) ** 2, axis=-1, keepdims=True)
        h1n = (h1 - mu2) * lax.rsqrt(var2 + LN_EPS)
        h1n = h1n * ln2w_ref[d] + ln2b_ref[d]

        # ---- MLP ----
        ff = jnp.dot(
            h1n.astype(jnp.bfloat16), w1_ref[d],
            preferred_element_type=jnp.float32,
        ) + b1_ref[d]
        # TODO(synk): PyTorch nn.GELU defaults to the exact erf form; the tanh
        # approximation is used here (small systematic numeric difference).
        ff = jax.nn.gelu(ff, approximate=True)
        ff = jnp.dot(
            ff.astype(jnp.bfloat16), w2_ref[d],
            preferred_element_type=jnp.float32,
        ) + b2_ref[d]

        h = h1 + ff                          # residual (f32)

    out_ref[0] = h.astype(out_ref.dtype)


# ---------------------------- pallas_call wrapper ---------------------------
@jax.jit
def _decoder_stack_forward(x3d, mask, stacked):
    b, s, h = x3d.shape
    params = [stacked[name] for name in PARAM_ORDER]

    in_specs = [
        pl.BlockSpec((1, s, h), lambda i: (i, 0, 0)),                 # per-batch x
        pl.BlockSpec((1, mask.shape[1], mask.shape[2]),
                     lambda i: (i, 0, 0)),                            # per-batch bias
    ]
    # Fully VMEM-resident stacked weights: full (DEPTH, ...) blocks, constant
    # index_map -> DMA'd once, never re-fetched across grid steps.
    in_specs += [pl.BlockSpec(p.shape, lambda i: (0, 0, 0)) for p in params]

    return pl.pallas_call(
        _decoder_stack_kernel,
        out_shape=jax.ShapeDtypeStruct((b, s, h), x3d.dtype),
        grid=(b,),
        in_specs=in_specs,
        out_specs=pl.BlockSpec((1, s, h), lambda i: (i, 0, 0)),
        scratch_shapes=[
            pltpu.VMEM((NUM_HEADS * s, h // NUM_HEADS), jnp.float32),  # packed Q
            pltpu.VMEM((NUM_HEADS * s, h // NUM_HEADS), jnp.float32),  # packed K
            pltpu.VMEM((NUM_HEADS * s, h // NUM_HEADS), jnp.float32),  # packed V
            pltpu.VMEM((s, h), jnp.float32),                           # context
        ],
        compiler_params=pltpu.CompilerParams(
            # Batch axis is independent -> shards across the 2 TCs on v7x,
            # harmless sequential loop on v5e/v6e.
            dimension_semantics=("parallel",),
        ),
    )(x3d, mask, *params)


def _build_attention_bias(batch, seq, num_heads, attention_mask=None):
    """Per-batch additive bias of shape (B, NH*S, NH*S): causal within each
    head, block-diagonal across heads (so the packed-head score matmul cannot
    attend across heads), plus optional key-padding mask."""
    idx = jnp.arange(seq)
    causal = idx[None, :] <= idx[:, None]                          # (S, S)
    allowed = jnp.broadcast_to(causal, (batch, seq, seq))
    if attention_mask is not None:
        keep = attention_mask.reshape(batch, seq).astype(bool)     # (B, S)
        allowed = allowed & keep[:, None, :]
    head_eye = jnp.eye(num_heads, dtype=bool)                      # (NH, NH)
    allowed_h = (head_eye[None, :, None, :, None]
                 & allowed[:, None, :, None, :])                   # (B,NH,S,NH,S)
    allowed_full = allowed_h.reshape(batch, num_heads * seq, num_heads * seq)
    # -1e30 is safe because the score/bias path stays in f32.
    return jnp.where(allowed_full, 0.0, -1e30).astype(jnp.float32)


# ----------------------- parameter init (deterministic) --------------------
def _init_layer_params(key):
    ks = jax.random.split(key, 6)
    s = 0.02
    wq = s * jax.random.normal(ks[0], (HIDDEN, HIDDEN), jnp.float32)
    wk = s * jax.random.normal(ks[1], (HIDDEN, HIDDEN), jnp.float32)
    wv = s * jax.random.normal(ks[2], (HIDDEN, HIDDEN), jnp.float32)
    return {
        "ln1_w": jnp.ones((1, HIDDEN), jnp.float32),
        "ln1_b": jnp.zeros((1, HIDDEN), jnp.float32),
        "wqkv": jnp.concatenate([wq, wk, wv], axis=1),        # (H, 3H)
        "bqkv": jnp.zeros((1, 3 * HIDDEN), jnp.float32),
        "wo": s * jax.random.normal(ks[3], (HIDDEN, HIDDEN), jnp.float32),
        "bo": jnp.zeros((1, HIDDEN), jnp.float32),
        "ln2_w": jnp.ones((1, HIDDEN), jnp.float32),
        "ln2_b": jnp.zeros((1, HIDDEN), jnp.float32),
        "w1": s * jax.random.normal(ks[4], (HIDDEN, FFN), jnp.float32),
        "b1": jnp.zeros((1, FFN), jnp.float32),
        "w2": s * jax.random.normal(ks[5], (FFN, HIDDEN), jnp.float32),
        "b2": jnp.zeros((1, HIDDEN), jnp.float32),
    }


# ----------------------------- decoder wrapper -----------------------------
class PraxisDecoderPallas:
    """Mirror of PraxisDecoder.forward: apply `depth` experts sequentially
    (fused into one Pallas kernel), collect (trivial) aux losses, and return
    the same 4-tuple (hidden_states, past_key_values, current_state, aux)."""

    def __init__(self, depth, key):
        self.depth = depth
        keys = jax.random.split(key, depth)
        layer_params = [_init_layer_params(k) for k in keys]
        stacked = {
            name: jnp.stack([lp[name] for lp in layer_params], axis=0)
            for name in PARAM_ORDER
        }
        # Pre-cast matmul weights to bf16 ONCE (halves weight DMA bytes and
        # removes per-layer VPU casts); LN params / biases stay f32.
        for name in ("wqkv", "wo", "w1", "w2"):
            stacked[name] = stacked[name].astype(jnp.bfloat16)
        self.stacked = stacked

    def __call__(self, inputs, current_state=None, attention_mask=None,
                 past_key_values=None, block_ids=None):
        B, S, H = inputs.shape
        bias = _build_attention_bias(B, S, NUM_HEADS, attention_mask)
        hidden_states = _decoder_stack_forward(inputs, bias, self.stacked)

        # Bookkeeping mirroring PraxisDecoder.forward (no router, no remotes).
        new_states = []
        aux_losses = []
        for i in range(self.depth):
            layer_state = current_state[i] if current_state is not None else None
            new_states.append(layer_state)
            aux_losses.append(jnp.float32(0.0))
        return hidden_states, past_key_values, current_state, sum(aux_losses)


# ---------------------------------- main -----------------------------------
if __name__ == "__main__":
    key = jax.random.PRNGKey(0)
    k_in, k_params = jax.random.split(key)

    x = jax.random.normal(k_in, (BATCH, SEQ, HIDDEN), jnp.float32)

    decoder = PraxisDecoderPallas(DEPTH, k_params)
    hidden_states, past_kv, cur_state, aux_sum = decoder(x)

    jax.block_until_ready(hidden_states)
    jax.block_until_ready(aux_sum)

    assert hidden_states.shape == (BATCH, SEQ, HIDDEN)
    assert hidden_states.dtype == jnp.float32
    assert bool(jnp.all(jnp.isfinite(hidden_states)))

    print("KERNEL_OK")
</pallas_src>

<mosaic_0001>
module attributes {stable_mosaic.version = 11 : i64} {
  func.func @_decoder_stack_kernel(%arg0: i32, %arg1: memref<1x8x32xf32, #tpu.memory_space<vmem>>, %arg2: memref<1x32x32xf32, #tpu.memory_space<vmem>>, %arg3: memref<2x1x32xf32, #tpu.memory_space<vmem>>, %arg4: memref<2x1x32xf32, #tpu.memory_space<vmem>>, %arg5: memref<2x32x96xbf16, #tpu.memory_space<vmem>>, %arg6: memref<2x1x96xf32, #tpu.memory_space<vmem>>, %arg7: memref<2x32x32xbf16, #tpu.memory_space<vmem>>, %arg8: memref<2x1x32xf32, #tpu.memory_space<vmem>>, %arg9: memref<2x1x32xf32, #tpu.memory_space<vmem>>, %arg10: memref<2x1x32xf32, #tpu.memory_space<vmem>>, %arg11: memref<2x32x128xbf16, #tpu.memory_space<vmem>>, %arg12: memref<2x1x128xf32, #tpu.memory_space<vmem>>, %arg13: memref<2x128x32xbf16, #tpu.memory_space<vmem>>, %arg14: memref<2x1x32xf32, #tpu.memory_space<vmem>>, %arg15: memref<1x8x32xf32, #tpu.memory_space<vmem>>, %arg16: memref<32x8xf32, #tpu.memory_space<vmem>>, %arg17: memref<32x8xf32, #tpu.memory_space<vmem>>, %arg18: memref<32x8xf32, #tpu.memory_space<vmem>>, %arg19: memref<8x32xf32, #tpu.memory_space<vmem>>) attributes {dimension_semantics = [#tpu.dimension_semantics<parallel>], iteration_bounds = array<i64: 2>, scalar_prefetch = 0 : i64, scratch_operands = 4 : i64, tpu.core_type = #tpu.core_type<tc>, window_params = [{transform_indices = @transform_0, window_bounds = array<i64: 1, 8, 32>}, {transform_indices = @transform_1, window_bounds = array<i64: 1, 32, 32>}, {pipeline_mode = #tpu.pipeline_mode<synchronous>, transform_indices = @transform_2, window_bounds = array<i64: 2, 1, 32>}, {pipeline_mode = #tpu.pipeline_mode<synchronous>, transform_indices = @transform_3, window_bounds = array<i64: 2, 1, 32>}, {pipeline_mode = #tpu.pipeline_mode<synchronous>, transform_indices = @transform_4, window_bounds = array<i64: 2, 32, 96>}, {pipeline_mode = #tpu.pipeline_mode<synchronous>, transform_indices = @transform_5, window_bounds = array<i64: 2, 1, 96>}, {pipeline_mode = #tpu.pipeline_mode<synchronous>, transform_indices = @transform_6, window_bounds = array<i64: 2, 32, 32>}, {pipeline_mode = #tpu.pipeline_mode<synchronous>, transform_indices = @transform_7, window_bounds = array<i64: 2, 1, 32>}, {pipeline_mode = #tpu.pipeline_mode<synchronous>, transform_indices = @transform_8, window_bounds = array<i64: 2, 1, 32>}, {pipeline_mode = #tpu.pipeline_mode<synchronous>, transform_indices = @transform_9, window_bounds = array<i64: 2, 1, 32>}, {pipeline_mode = #tpu.pipeline_mode<synchronous>, transform_indices = @transform_10, window_bounds = array<i64: 2, 32, 128>}, {pipeline_mode = #tpu.pipeline_mode<synchronous>, transform_indices = @transform_11, window_bounds = array<i64: 2, 1, 128>}, {pipeline_mode = #tpu.pipeline_mode<synchronous>, transform_indices = @transform_12, window_bounds = array<i64: 2, 128, 32>}, {pipeline_mode = #tpu.pipeline_mode<synchronous>, transform_indices = @transform_13, window_bounds = array<i64: 2, 1, 32>}, {transform_indices = @transform_14, window_bounds = array<i64: 1, 8, 32>}]} {
    %c0 = arith.constant 0 : index
    %c0_0 = arith.constant 0 : index
    %c0_1 = arith.constant 0 : index
    %0 = vector.load %arg2[%c0, %c0_0, %c0_1] : memref<1x32x32xf32, #tpu.memory_space<vmem>>, vector<1x32x32xf32>
    %1 = vector.shape_cast %0 : vector<1x32x32xf32> to vector<32x32xf32>
    %c0_2 = arith.constant 0 : index
    %c0_3 = arith.constant 0 : index
    %c0_4 = arith.constant 0 : index
    %2 = vector.load %arg1[%c0_2, %c0_3, %c0_4] : memref<1x8x32xf32, #tpu.memory_space<vmem>>, vector<1x8x32xf32>
    %3 = vector.shape_cast %2 : vector<1x8x32xf32> to vector<8x32xf32>
    %cst = arith.constant dense<0.000000e+00> : vector<8xf32>
    %4 = vector.multi_reduction <add>, %3, %cst [1] : vector<8x32xf32> to vector<8xf32>
    %5 = vector.shape_cast %4 : vector<8xf32> to vector<8x1xf32>
    %cst_5 = arith.constant 3.200000e+01 : f32
    %6 = vector.broadcast %cst_5 : f32 to vector<8x1xf32>
    %7 = arith.divf %5, %6 : vector<8x1xf32>
    %8 = vector.broadcast %7 : vector<8x1xf32> to vector<8x32xf32>
    %9 = arith.subf %3, %8 : vector<8x32xf32>
    %10 = arith.mulf %9, %9 : vector<8x32xf32>
    %cst_6 = arith.constant dense<0.000000e+00> : vector<8xf32>
    %11 = vector.multi_reduction <add>, %10, %cst_6 [1] : vector<8x32xf32> to vector<8xf32>
    %12 = vector.shape_cast %11 : vector<8xf32> to vector<8x1xf32>
    %cst_7 = arith.constant 3.200000e+01 : f32
    %13 = vector.broadcast %cst_7 : f32 to vector<8x1xf32>
    %14 = arith.divf %12, %13 : vector<8x1xf32>
    %15 = vector.broadcast %7 : vector<8x1xf32> to vector<8x32xf32>
    %16 = arith.subf %3, %15 : vector<8x32xf32>
    %cst_8 = arith.constant 9.99999974E-6 : f32
    %17 = vector.broadcast %cst_8 : f32 to vector<8x1xf32>
    %18 = arith.addf %14, %17 : vector<8x1xf32>
    %19 = math.rsqrt %18 : vector<8x1xf32>
    %20 = vector.broadcast %19 : vector<8x1xf32> to vector<8x32xf32>
    %21 = arith.mulf %16, %20 : vector<8x32xf32>
    %c0_9 = arith.constant 0 : index
    %c0_10 = arith.constant 0 : index
    %c0_11 = arith.constant 0 : index
    %22 = vector.load %arg3[%c0_9, %c0_10, %c0_11] : memref<2x1x32xf32, #tpu.memory_space<vmem>>, vector<1x1x32xf32>
    %23 = vector.shape_cast %22 : vector<1x1x32xf32> to vector<1x32xf32>
    %24 = vector.broadcast %23 : vector<1x32xf32> to vector<8x32xf32>
    %25 = arith.mulf %21, %24 : vector<8x32xf32>
    %c0_12 = arith.constant 0 : index
    %c0_13 = arith.constant 0 : index
    %c0_14 = arith.constant 0 : index
    %26 = vector.load %arg4[%c0_12, %c0_13, %c0_14] : memref<2x1x32xf32, #tpu.memory_space<vmem>>, vector<1x1x32xf32>
    %27 = vector.shape_cast %26 : vector<1x1x32xf32> to vector<1x32xf32>
    %28 = vector.broadcast %27 : vector<1x32xf32> to vector<8x32xf32>
    %29 = arith.addf %25, %28 : vector<8x32xf32>
    %30 = arith.truncf %29 : vector<8x32xf32> to vector<8x32xbf16>
    %c0_15 = arith.constant 0 : index
    %c0_16 = arith.constant 0 : index
    %c0_17 = arith.constant 0 : index
    %31 = vector.load %arg5[%c0_15, %c0_16, %c0_17] : memref<2x32x96xbf16, #tpu.memory_space<vmem>>, vector<1x32x96xbf16>
    %32 = vector.shape_cast %31 : vector<1x32x96xbf16> to vector<32x96xbf16>
    %cst_18 = arith.constant dense<0.000000e+00> : vector<8x96xf32>
    %33 = tpu.matmul %30, %32, %cst_18 {dimension_numbers = #tpu.dot_dimension_numbers<[1], [0], [0], [1], [0, 0, 1, 1], [], []>} : vector<8x32xbf16>, vector<32x96xbf16>, vector<8x96xf32> -> vector<8x96xf32>
    %c0_19 = arith.constant 0 : index
    %c0_20 = arith.constant 0 : index
    %c0_21 = arith.constant 0 : index
    %34 = vector.load %arg6[%c0_19, %c0_20, %c0_21] : memref<2x1x96xf32, #tpu.memory_space<vmem>>, vector<1x1x96xf32>
    %35 = vector.shape_cast %34 : vector<1x1x96xf32> to vector<1x96xf32>
    %36 = vector.broadcast %35 : vector<1x96xf32> to vector<8x96xf32>
    %37 = arith.addf %33, %36 : vector<8x96xf32>
    %38 = vector.extract_strided_slice %37 {offsets = [0, 0], sizes = [8, 8], strides = [1, 1]} : vector<8x96xf32> to vector<8x8xf32>
    %cst_22 = arith.constant 0.353553385 : f32
    %39 = vector.broadcast %cst_22 : f32 to vector<8x8xf32>
    %40 = arith.mulf %38, %39 : vector<8x8xf32>
    %c0_23 = arith.constant 0 : index
    %c0_24 = arith.constant 0 : index
    %41 = vector.load %arg16[%c0_23, %c0_24] : memref<32x8xf32, #tpu.memory_space<vmem>>, vector<8x8xf32>
    tpu.vector_store %arg16[%c0_23, %c0_24], %40 {strides = array<i32>} : memref<32x8xf32, #tpu.memory_space<vmem>>, vector<8x8xf32>,
    %42 = vector.extract_strided_slice %37 {offsets = [0, 32], sizes = [8, 8], strides = [1, 1]} : vector<8x96xf32> to vector<8x8xf32>
    %c0_25 = arith.constant 0 : index
    %c0_26 = arith.constant 0 : index
    %43 = vector.load %arg17[%c0_25, %c0_26] : memref<32x8xf32, #tpu.memory_space<vmem>>, vector<8x8xf32>
    tpu.vector_store %arg17[%c0_25, %c0_26], %42 {strides = array<i32>} : memref<32x8xf32, #tpu.memory_space<vmem>>, vector<8x8xf32>,
    %44 = vector.extract_strided_slice %37 {offsets = [0, 64], sizes = [8, 8], strides = [1, 1]} : vector<8x96xf32> to vector<8x8xf32>
    %c0_27 = arith.constant 0 : index
    %c0_28 = arith.constant 0 : index
    %45 = vector.load %arg18[%c0_27, %c0_28] : memref<32x8xf32, #tpu.memory_space<vmem>>, vector<8x8xf32>
    tpu.vector_store %arg18[%c0_27, %c0_28], %44 {strides = array<i32>} : memref<32x8xf32, #tpu.memory_space<vmem>>, vector<8x8xf32>,
    %46 = vector.extract_strided_slice %37 {offsets = [0, 8], sizes = [8, 8], strides = [1, 1]} : vector<8x96xf32> to vector<8x8xf32>
    %cst_29 = arith.constant 0.353553385 : f32
    %47 = vector.broadcast %cst_29 : f32 to vector<8x8xf32>
    %48 = arith.mulf %46, %47 : vector<8x8xf32>
    %c8 = arith.constant 8 : index
    %c0_30 = arith.constant 0 : index
    %49 = vector.load %arg16[%c8, %c0_30] : memref<32x8xf32, #tpu.memory_space<vmem>>, vector<8x8xf32>
    tpu.vector_store %arg16[%c8, %c0_30], %48 {strides = array<i32>} : memref<32x8xf32, #tpu.memory_space<vmem>>, vector<8x8xf32>,
    %50 = vector.extract_strided_slice %37 {offsets = [0, 40], sizes = [8, 8], strides = [1, 1]} : vector<8x96xf32> to vector<8x8xf32>
    %c8_31 = arith.constant 8 : index
    %c0_32 = arith.constant 0 : index
    %51 = vector.load %arg17[%c8_31, %c0_32] : memref<32x8xf32, #tpu.memory_space<vmem>>, vector<8x8xf32>
    tpu.vector_store %arg17[%c8_31, %c0_32], %50 {strides = array<i32>} : memref<32x8xf32, #tpu.memory_space<vmem>>, vector<8x8xf32>,
    %52 = vector.extract_strided_slice %37 {offsets = [0, 72], sizes = [8, 8], strides = [1, 1]} : vector<8x96xf32> to vector<8x8xf32>
    %c8_33 = arith.constant 8 : index
    %c0_34 = arith.constant 0 : index
    %53 = vector.load %arg18[%c8_33, %c0_34] : memref<32x8xf32, #tpu.memory_space<vmem>>, vector<8x8xf32>
    tpu.vector_store %arg18[%c8_33, %c0_34], %52 {strides = array<i32>} : memref<32x8xf32, #tpu.memory_space<vmem>>, vector<8x8xf32>,
    %54 = vector.extract_strided_slice %37 {offsets = [0, 16], sizes = [8, 8], strides = [1, 1]} : vector<8x96xf32> to vector<8x8xf32>
    %cst_35 = arith.constant 0.353553385 : f32
    %55 = vector.broadcast %cst_35 : f32 to vector<8x8xf32>
    %56 = arith.mulf %54, %55 : vector<8x8xf32>
    %c16 = arith.constant 16 : index
    %c0_36 = arith.constant 0 : index
    %57 = vector.load %arg16[%c16, %c0_36] : memref<32x8xf32, #tpu.memory_space<vmem>>, vector<8x8xf32>
    tpu.vector_store %arg16[%c16, %c0_36], %56 {strides = array<i32>} : memref<32x8xf32, #tpu.memory_space<vmem>>, vector<8x8xf32>,
    %58 = vector.extract_strided_slice %37 {offsets = [0, 48], sizes = [8, 8], strides = [1, 1]} : vector<8x96xf32> to vector<8x8xf32>
    %c16_37 = arith.constant 16 : index
    %c0_38 = arith.constant 0 : index
    %59 = vector.load %arg17[%c16_37, %c0_38] : memref<32x8xf32, #tpu.memory_space<vmem>>, vector<8x8xf32>
    tpu.vector_store %arg17[%c16_37, %c0_38], %58 {strides = array<i32>} : memref<32x8xf32, #tpu.memory_space<vmem>>, vector<8x8xf32>,
    %60 = vector.extract_strided_slice %37 {offsets = [0, 80], sizes = [8, 8], strides = [1, 1]} : vector<8x96xf32> to vector<8x8xf32>
    %c16_39 = arith.constant 16 : index
    %c0_40 = arith.constant 0 : index
    %61 = vector.load %arg18[%c16_39, %c0_40] : memref<32x8xf32, #tpu.memory_space<vmem>>, vector<8x8xf32>
    tpu.vector_store %arg18[%c16_39, %c0_40], %60 {strides = array<i32>} : memref<32x8xf32, #tpu.memory_space<vmem>>, vector<8x8xf32>,
    %62 = vector.extract_strided_slice %37 {offsets = [0, 24], sizes = [8, 8], strides = [1, 1]} : vector<8x96xf32> to vector<8x8xf32>
    %cst_41 = arith.constant 0.353553385 : f32
    %63 = vector.broadcast %cst_41 : f32 to vector<8x8xf32>
    %64 = arith.mulf %62, %63 : vector<8x8xf32>
    %c24 = arith.constant 24 : index
    %c0_42 = arith.constant 0 : index
    %65 = vector.load %arg16[%c24, %c0_42] : memref<32x8xf32, #tpu.memory_space<vmem>>, vector<8x8xf32>
    tpu.vector_store %arg16[%c24, %c0_42], %64 {strides = array<i32>} : memref<32x8xf32, #tpu.memory_space<vmem>>, vector<8x8xf32>,
    %66 = vector.extract_strided_slice %37 {offsets = [0, 56], sizes = [8, 8], strides = [1, 1]} : vector<8x96xf32> to vector<8x8xf32>
    %c24_43 = arith.constant 24 : index
    %c0_44 = arith.constant 0 : index
    %67 = vector.load %arg17[%c24_43, %c0_44] : memref<32x8xf32, #tpu.memory_space<vmem>>, vector<8x8xf32>
    tpu.vector_store %arg17[%c24_43, %c0_44], %66 {strides = array<i32>} : memref<32x8xf32, #tpu.memory_space<vmem>>, vector<8x8xf32>,
    %68 = vector.extract_strided_slice %37 {offsets = [0, 88], sizes = [8, 8], strides = [1, 1]} : vector<8x96xf32> to vector<8x8xf32>
    %c24_45 = arith.constant 24 : index
    %c0_46 = arith.constant 0 : index
    %69 = vector.load %arg18[%c24_45, %c0_46] : memref<32x8xf32, #tpu.memory_space<vmem>>, vector<8x8xf32>
    tpu.vector_store %arg18[%c24_45, %c0_46], %68 {strides = array<i32>} : memref<32x8xf32, #tpu.memory_space<vmem>>, vector<8x8xf32>,
    %c0_47 = arith.constant 0 : index
    %c0_48 = arith.constant 0 : index
    %70 = vector.load %arg16[%c0_47, %c0_48] : memref<32x8xf32, #tpu.memory_space<vmem>>, vector<32x8xf32>
    %71 = arith.truncf %70 : vector<32x8xf32> to vector<32x8xbf16>
    %c0_49 = arith.constant 0 : index
    %c0_50 = arith.constant 0 : index
    %72 = vector.load %arg17[%c0_49, %c0_50] : memref<32x8xf32, #tpu.memory_space<vmem>>, vector<32x8xf32>
    %73 = arith.truncf %72 : vector<32x8xf32> to vector<32x8xbf16>
    %c0_51 = arith.constant 0 : index
    %c0_52 = arith.constant 0 : index
    %74 = vector.load %arg18[%c0_51, %c0_52] : memref<32x8xf32, #tpu.memory_space<vmem>>, vector<32x8xf32>
    %75 = arith.truncf %74 : vector<32x8xf32> to vector<32x8xbf16>
    %cst_53 = arith.constant dense<0.000000e+00> : vector<32x32xf32>
    %76 = tpu.matmul %71, %73, %cst_53 {dimension_numbers = #tpu.dot_dimension_numbers<[1], [1], [0], [0], [0, 0, 1, 0], [], []>} : vector<32x8xbf16>, vector<32x8xbf16>, vector<32x32xf32> -> vector<32x32xf32>
    %77 = arith.addf %76, %1 : vector<32x32xf32>
    %cst_54 = arith.constant dense<0xFF800000> : vector<32xf32>
    %78 = vector.multi_reduction <maximumf>, %77, %cst_54 [1] : vector<32x32xf32> to vector<32xf32>
    %79 = vector.shape_cast %78 : vector<32xf32> to vector<32x1xf32>
    %80 = vector.broadcast %79 : vector<32x1xf32> to vector<32x32xf32>
    %81 = arith.subf %77, %80 : vector<32x32xf32>
    %82 = math.exp %81 : vector<32x32xf32>
    %cst_55 = arith.constant dense<0.000000e+00> : vector<32xf32>
    %83 = vector.multi_reduction <add>, %82, %cst_55 [1] : vector<32x32xf32> to vector<32xf32>
    %84 = vector.shape_cast %83 : vector<32xf32> to vector<32x1xf32>
    %85 = arith.truncf %82 : vector<32x32xf32> to vector<32x32xbf16>
    %cst_56 = arith.constant dense<0.000000e+00> : vector<32x8xf32>
    %86 = tpu.matmul %85, %75, %cst_56 {dimension_numbers = #tpu.dot_dimension_numbers<[1], [0], [0], [1], [0, 0, 1, 1], [], []>} : vector<32x32xbf16>, vector<32x8xbf16>, vector<32x8xf32> -> vector<32x8xf32>
    %87 = tpu.reciprocal %84 {approx = true} : vector<32x1xf32> -> vector<32x1xf32>
    %88 = vector.broadcast %87 : vector<32x1xf32> to vector<32x8xf32>
    %89 = arith.mulf %86, %88 : vector<32x8xf32>
    %90 = vector.extract_strided_slice %89 {offsets = [0, 0], sizes = [8, 8], strides = [1, 1]} : vector<32x8xf32> to vector<8x8xf32>
    %c0_57 = arith.constant 0 : index
    %c0_58 = arith.constant 0 : index
    %91 = vector.load %arg19[%c0_57, %c0_58] : memref<8x32xf32, #tpu.memory_space<vmem>>, vector<8x8xf32>
    tpu.vector_store %arg19[%c0_57, %c0_58], %90 {strides = array<i32>} : memref<8x32xf32, #tpu.memory_space<vmem>>, vector<8x8xf32>,
    %92 = vector.extract_strided_slice %89 {offsets = [8, 0], sizes = [8, 8], strides = [1, 1]} : vector<32x8xf32> to vector<8x8xf32>
    %c0_59 = arith.constant 0 : index
    %c8_60 = arith.constant 8 : index
    %93 = vector.load %arg19[%c0_59, %c8_60] : memref<8x32xf32, #tpu.memory_space<vmem>>, vector<8x8xf32>
    tpu.vector_store %arg19[%c0_59, %c8_60], %92 {strides = array<i32>} : memref<8x32xf32, #tpu.memory_space<vmem>>, vector<8x8xf32>,
    %94 = vector.extract_strided_slice %89 {offsets = [16, 0], sizes = [8, 8], strides = [1, 1]} : vector<32x8xf32> to vector<8x8xf32>
    %c0_61 = arith.constant 0 : index
    %c16_62 = arith.constant 16 : index
    %95 = vector.load %arg19[%c0_61, %c16_62] : memref<8x32xf32, #tpu.memory_space<vmem>>, vector<8x8xf32>
    tpu.vector_store %arg19[%c0_61, %c16_62], %94 {strides = array<i32>} : memref<8x32xf32, #tpu.memory_space<vmem>>, vector<8x8xf32>,
    %96 = vector.extract_strided_slice %89 {offsets = [24, 0], sizes = [8, 8], strides = [1, 1]} : vector<32x8xf32> to vector<8x8xf32>
    %c0_63 = arith.constant 0 : index
    %c24_64 = arith.constant 24 : index
    %97 = vector.load %arg19[%c0_63, %c24_64] : memref<8x32xf32, #tpu.memory_space<vmem>>, vector<8x8xf32>
    tpu.vector_store %arg19[%c0_63, %c24_64], %96 {strides = array<i32>} : memref<8x32xf32, #tpu.memory_space<vmem>>, vector<8x8xf32>,
    %c0_65 = arith.constant 0 : index
    %c0_66 = arith.constant 0 : index
    %98 = vector.load %arg19[%c0_65, %c0_66] : memref<8x32xf32, #tpu.memory_space<vmem>>, vector<8x32xf32>
    %99 = arith.truncf %98 : vector<8x32xf32> to vector<8x32xbf16>
    %c0_67 = arith.constant 0 : index
    %c0_68 = arith.constant 0 : index
    %c0_69 = arith.constant 0 : index
    %100 = vector.load %arg7[%c0_67, %c0_68, %c0_69] : memref<2x32x32xbf16, #tpu.memory_space<vmem>>, vector<1x32x32xbf16>
    %101 = vector.shape_cast %100 : vector<1x32x32xbf16> to vector<32x32xbf16>
    %cst_70 = arith.constant dense<0.000000e+00> : vector<8x32xf32>
    %102 = tpu.matmul %99, %101, %cst_70 {dimension_numbers = #tpu.dot_dimension_numbers<[1], [0], [0], [1], [0, 0, 1, 1], [], []>} : vector<8x32xbf16>, vector<32x32xbf16>, vector<8x32xf32> -> vector<8x32xf32>
    %c0_71 = arith.constant 0 : index
    %c0_72 = arith.constant 0 : index
    %c0_73 = arith.constant 0 : index
    %103 = vector.load %arg8[%c0_71, %c0_72, %c0_73] : memref<2x1x32xf32, #tpu.memory_space<vmem>>, vector<1x1x32xf32>
    %104 = vector.shape_cast %103 : vector<1x1x32xf32> to vector<1x32xf32>
    %105 = vector.broadcast %104 : vector<1x32xf32> to vector<8x32xf32>
    %106 = arith.addf %102, %105 : vector<8x32xf32>
    %107 = arith.addf %3, %106 : vector<8x32xf32>
    %cst_74 = arith.constant dense<0.000000e+00> : vector<8xf32>
    %108 = vector.multi_reduction <add>, %107, %cst_74 [1] : vector<8x32xf32> to vector<8xf32>
    %109 = vector.shape_cast %108 : vector<8xf32> to vector<8x1xf32>
    %cst_75 = arith.constant 3.200000e+01 : f32
    %110 = vector.broadcast %cst_75 : f32 to vector<8x1xf32>
    %111 = arith.divf %109, %110 : vector<8x1xf32>
    %112 = vector.broadcast %111 : vector<8x1xf32> to vector<8x32xf32>
    %113 = arith.subf %107, %112 : vector<8x32xf32>
    %114 = arith.mulf %113, %113 : vector<8x32xf32>
    %cst_76 = arith.constant dense<0.000000e+00> : vector<8xf32>
    %115 = vector.multi_reduction <add>, %114, %cst_76 [1] : vector<8x32xf32> to vector<8xf32>
    %116 = vector.shape_cast %115 : vector<8xf32> to vector<8x1xf32>
    %cst_77 = arith.constant 3.200000e+01 : f32
    %117 = vector.broadcast %cst_77 : f32 to vector<8x1xf32>
    %118 = arith.divf %116, %117 : vector<8x1xf32>
    %119 = vector.broadcast %111 : vector<8x1xf32> to vector<8x32xf32>
    %120 = arith.subf %107, %119 : vector<8x32xf32>
    %cst_78 = arith.constant 9.99999974E-6 : f32
    %121 = vector.broadcast %cst_78 : f32 to vector<8x1xf32>
    %122 = arith.addf %118, %121 : vector<8x1xf32>
    %123 = math.rsqrt %122 : vector<8x1xf32>
    %124 = vector.broadcast %123 : vector<8x1xf32> to vector<8x32xf32>
    %125 = arith.mulf %120, %124 : vector<8x32xf32>
    %c0_79 = arith.constant 0 : index
    %c0_80 = arith.constant 0 : index
    %c0_81 = arith.constant 0 : index
    %126 = vector.load %arg9[%c0_79, %c0_80, %c0_81] : memref<2x1x32xf32, #tpu.memory_space<vmem>>, vector<1x1x32xf32>
    %127 = vector.shape_cast %126 : vector<1x1x32xf32> to vector<1x32xf32>
    %128 = vector.broadcast %127 : vector<1x32xf32> to vector<8x32xf32>
    %129 = arith.mulf %125, %128 : vector<8x32xf32>
    %c0_82 = arith.constant 0 : index
    %c0_83 = arith.constant 0 : index
    %c0_84 = arith.constant 0 : index
    %130 = vector.load %arg10[%c0_82, %c0_83, %c0_84] : memref<2x1x32xf32, #tpu.memory_space<vmem>>, vector<1x1x32xf32>
    %131 = vector.shape_cast %130 : vector<1x1x32xf32> to vector<1x32xf32>
    %132 = vector.broadcast %131 : vector<1x32xf32> to vector<8x32xf32>
    %133 = arith.addf %129, %132 : vector<8x32xf32>
    %134 = arith.truncf %133 : vector<8x32xf32> to vector<8x32xbf16>
    %c0_85 = arith.constant 0 : index
    %c0_86 = arith.constant 0 : index
    %c0_87 = arith.constant 0 : index
    %135 = vector.load %arg11[%c0_85, %c0_86, %c0_87] : memref<2x32x128xbf16, #tpu.memory_space<vmem>>, vector<1x32x128xbf16>
    %136 = vector.shape_cast %135 : vector<1x32x128xbf16> to vector<32x128xbf16>
    %cst_88 = arith.constant dense<0.000000e+00> : vector<8x128xf32>
    %137 = tpu.matmul %134, %136, %cst_88 {dimension_numbers = #tpu.dot_dimension_numbers<[1], [0], [0], [1], [0, 0, 1, 1], [], []>} : vector<8x32xbf16>, vector<32x128xbf16>, vector<8x128xf32> -> vector<8x128xf32>
    %c0_89 = arith.constant 0 : index
    %c0_90 = arith.constant 0 : index
    %c0_91 = arith.constant 0 : index
    %138 = vector.load %arg12[%c0_89, %c0_90, %c0_91] : memref<2x1x128xf32, #tpu.memory_space<vmem>>, vector<1x1x128xf32>
    %139 = vector.shape_cast %138 : vector<1x1x128xf32> to vector<1x128xf32>
    %140 = vector.broadcast %139 : vector<1x128xf32> to vector<8x128xf32>
    %141 = arith.addf %137, %140 : vector<8x128xf32>
    %142 = arith.mulf %141, %141 : vector<8x128xf32>
    %143 = arith.mulf %141, %142 : vector<8x128xf32>
    %cst_92 = arith.constant 4.471500e-02 : f32
    %144 = vector.broadcast %cst_92 : f32 to vector<8x128xf32>
    %145 = arith.mulf %144, %143 : vector<8x128xf32>
    %146 = arith.addf %141, %145 : vector<8x128xf32>
    %cst_93 = arith.constant 0.797884583 : f32
    %147 = vector.broadcast %cst_93 : f32 to vector<8x128xf32>
    %148 = arith.mulf %147, %146 : vector<8x128xf32>
    %149 = math.tanh %148 : vector<8x128xf32>
    %cst_94 = arith.constant 1.000000e+00 : f32
    %150 = vector.broadcast %cst_94 : f32 to vector<8x128xf32>
    %151 = arith.addf %150, %149 : vector<8x128xf32>
    %cst_95 = arith.constant 5.000000e-01 : f32
    %152 = vector.broadcast %cst_95 : f32 to vector<8x128xf32>
    %153 = arith.mulf %152, %151 : vector<8x128xf32>
    %154 = arith.mulf %141, %153 : vector<8x128xf32>
    %155 = arith.truncf %154 : vector<8x128xf32> to vector<8x128xbf16>
    %c0_96 = arith.constant 0 : index
    %c0_97 = arith.constant 0 : index
    %c0_98 = arith.constant 0 : index
    %156 = vector.load %arg13[%c0_96, %c0_97, %c0_98] : memref<2x128x32xbf16, #tpu.memory_space<vmem>>, vector<1x128x32xbf16>
    %157 = vector.shape_cast %156 : vector<1x128x32xbf16> to vector<128x32xbf16>
    %cst_99 = arith.constant dense<0.000000e+00> : vector<8x32xf32>
    %158 = tpu.matmul %155, %157, %cst_99 {dimension_numbers = #tpu.dot_dimension_numbers<[1], [0], [0], [1], [0, 0, 1, 1], [], []>} : vector<8x128xbf16>, vector<128x32xbf16>, vector<8x32xf32> -> vector<8x32xf32>
    %c0_100 = arith.constant 0 : index
    %c0_101 = arith.constant 0 : index
    %c0_102 = arith.constant 0 : index
    %159 = vector.load %arg14[%c0_100, %c0_101, %c0_102] : memref<2x1x32xf32, #tpu.memory_space<vmem>>, vector<1x1x32xf32>
    %160 = vector.shape_cast %159 : vector<1x1x32xf32> to vector<1x32xf32>
    %161 = vector.broadcast %160 : vector<1x32xf32> to vector<8x32xf32>
    %162 = arith.addf %158, %161 : vector<8x32xf32>
    %163 = arith.addf %107, %162 : vector<8x32xf32>
    %cst_103 = arith.constant dense<0.000000e+00> : vector<8xf32>
    %164 = vector.multi_reduction <add>, %163, %cst_103 [1] : vector<8x32xf32> to vector<8xf32>
    %165 = vector.shape_cast %164 : vector<8xf32> to vector<8x1xf32>
    %cst_104 = arith.constant 3.200000e+01 : f32
    %166 = vector.broadcast %cst_104 : f32 to vector<8x1xf32>
    %167 = arith.divf %165, %166 : vector<8x1xf32>
    %168 = vector.broadcast %167 : vector<8x1xf32> to vector<8x32xf32>
    %169 = arith.subf %163, %168 : vector<8x32xf32>
    %170 = arith.mulf %169, %169 : vector<8x32xf32>
    %cst_105 = arith.constant dense<0.000000e+00> : vector<8xf32>
    %171 = vector.multi_reduction <add>, %170, %cst_105 [1] : vector<8x32xf32> to vector<8xf32>
    %172 = vector.shape_cast %171 : vector<8xf32> to vector<8x1xf32>
    %cst_106 = arith.constant 3.200000e+01 : f32
    %173 = vector.broadcast %cst_106 : f32 to vector<8x1xf32>
    %174 = arith.divf %172, %173 : vector<8x1xf32>
    %175 = vector.broadcast %167 : vector<8x1xf32> to vector<8x32xf32>
    %176 = arith.subf %163, %175 : vector<8x32xf32>
    %cst_107 = arith.constant 9.99999974E-6 : f32
    %177 = vector.broadcast %cst_107 : f32 to vector<8x1xf32>
    %178 = arith.addf %174, %177 : vector<8x1xf32>
    %179 = math.rsqrt %178 : vector<8x1xf32>
    %180 = vector.broadcast %179 : vector<8x1xf32> to vector<8x32xf32>
    %181 = arith.mulf %176, %180 : vector<8x32xf32>
    %c1 = arith.constant 1 : index
    %c0_108 = arith.constant 0 : index
    %c0_109 = arith.constant 0 : index
    %182 = vector.load %arg3[%c1, %c0_108, %c0_109] : memref<2x1x32xf32, #tpu.memory_space<vmem>>, vector<1x1x32xf32>
    %183 = vector.shape_cast %182 : vector<1x1x32xf32> to vector<1x32xf32>
    %184 = vector.broadcast %183 : vector<1x32xf32> to vector<8x32xf32>
    %185 = arith.mulf %181, %184 : vector<8x32xf32>
    %c1_110 = arith.constant 1 : index
    %c0_111 = arith.constant 0 : index
    %c0_112 = arith.constant 0 : index
    %186 = vector.load %arg4[%c1_110, %c0_111, %c0_112] : memref<2x1x32xf32, #tpu.memory_space<vmem>>, vector<1x1x32xf32>
    %187 = vector.shape_cast %186 : vector<1x1x32xf32> to vector<1x32xf32>
    %188 = vector.broadcast %187 : vector<1x32xf32> to vector<8x32xf32>
    %189 = arith.addf %185, %188 : vector<8x32xf32>
    %190 = arith.truncf %189 : vector<8x32xf32> to vector<8x32xbf16>
    %c1_113 = arith.constant 1 : index
    %c0_114 = arith.constant 0 : index
    %c0_115 = arith.constant 0 : index
    %191 = vector.load %arg5[%c1_113, %c0_114, %c0_115] : memref<2x32x96xbf16, #tpu.memory_space<vmem>>, vector<1x32x96xbf16>
    %192 = vector.shape_cast %191 : vector<1x32x96xbf16> to vector<32x96xbf16>
    %cst_116 = arith.constant dense<0.000000e+00> : vector<8x96xf32>
    %193 = tpu.matmul %190, %192, %cst_116 {dimension_numbers = #tpu.dot_dimension_numbers<[1], [0], [0], [1], [0, 0, 1, 1], [], []>} : vector<8x32xbf16>, vector<32x96xbf16>, vector<8x96xf32> -> vector<8x96xf32>
    %c1_117 = arith.constant 1 : index
    %c0_118 = arith.constant 0 : index
    %c0_119 = arith.constant 0 : index
    %194 = vector.load %arg6[%c1_117, %c0_118, %c0_119] : memref<2x1x96xf32, #tpu.memory_space<vmem>>, vector<1x1x96xf32>
    %195 = vector.shape_cast %194 : vector<1x1x96xf32> to vector<1x96xf32>
    %196 = vector.broadcast %195 : vector<1x96xf32> to vector<8x96xf32>
    %197 = arith.addf %193, %196 : vector<8x96xf32>
    %198 = vector.extract_strided_slice %197 {offsets = [0, 0], sizes = [8, 8], strides = [1, 1]} : vector<8x96xf32> to vector<8x8xf32>
    %cst_120 = arith.constant 0.353553385 : f32
    %199 = vector.broadcast %cst_120 : f32 to vector<8x8xf32>
    %200 = arith.mulf %198, %199 : vector<8x8xf32>
    %c0_121 = arith.constant 0 : index
    %c0_122 = arith.constant 0 : index
    %201 = vector.load %arg16[%c0_121, %c0_122] : memref<32x8xf32, #tpu.memory_space<vmem>>, vector<8x8xf32>
    tpu.vector_store %arg16[%c0_121, %c0_122], %200 {strides = array<i32>} : memref<32x8xf32, #tpu.memory_space<vmem>>, vector<8x8xf32>,
    %202 = vector.extract_strided_slice %197 {offsets = [0, 32], sizes = [8, 8], strides = [1, 1]} : vector<8x96xf32> to vector<8x8xf32>
    %c0_123 = arith.constant 0 : index
    %c0_124 = arith.constant 0 : index
    %203 = vector.load %arg17[%c0_123, %c0_124] : memref<32x8xf32, #tpu.memory_space<vmem>>, vector<8x8xf32>
    tpu.vector_store %arg17[%c0_123, %c0_124], %202 {strides = array<i32>} : memref<32x8xf32, #tpu.memory_space<vmem>>, vector<8x8xf32>,
    %204 = vector.extract_strided_slice %197 {offsets = [0, 64], sizes = [8, 8], strides = [1, 1]} : vector<8x96xf32> to vector<8x8xf32>
    %c0_125 = arith.constant 0 : index
    %c0_126 = arith.constant 0 : index
    %205 = vector.load %arg18[%c0_125, %c0_126] : memref<32x8xf32, #tpu.memory_space<vmem>>, vector<8x8xf32>
    tpu.vector_store %arg18[%c0_125, %c0_126], %204 {strides = array<i32>} : memref<32x8xf32, #tpu.memory_space<vmem>>, vector<8x8xf32>,
    %206 = vector.extract_strided_slice %197 {offsets = [0, 8], sizes = [8, 8], strides = [1, 1]} : vector<8x96xf32> to vector<8x8xf32>
    %cst_127 = arith.constant 0.353553385 : f32
    %207 = vector.broadcast %cst_127 : f32 to vector<8x8xf32>
    %208 = arith.mulf %206, %207 : vector<8x8xf32>
    %c8_128 = arith.constant 8 : index
    %c0_129 = arith.constant 0 : index
    %209 = vector.load %arg16[%c8_128, %c0_129] : memref<32x8xf32, #tpu.memory_space<vmem>>, vector<8x8xf32>
    tpu.vector_store %arg16[%c8_128, %c0_129], %208 {strides = array<i32>} : memref<32x8xf32, #tpu.memory_space<vmem>>, vector<8x8xf32>,
    %210 = vector.extract_strided_slice %197 {offsets = [0, 40], sizes = [8, 8], strides = [1, 1]} : vector<8x96xf32> to vector<8x8xf32>
    %c8_130 = arith.constant 8 : index
    %c0_131 = arith.constant 0 : index
    %211 = vector.load %arg17[%c8_130, %c0_131] : memref<32x8xf32, #tpu.memory_space<vmem>>, vector<8x8xf32>
    tpu.vector_store %arg17[%c8_130, %c0_131], %210 {strides = array<i32>} : memref<32x8xf32, #tpu.memory_space<vmem>>, vector<8x8xf32>,
    %212 = vector.extract_strided_slice %197 {offsets = [0, 72], sizes = [8, 8], strides = [1, 1]} : vector<8x96xf32> to vector<8x8xf32>
    %c8_132 = arith.constant 8 : index
    %c0_133 = arith.constant 0 : index
    %213 = vector.load %arg18[%c8_132, %c0_133] : memref<32x8xf32, #tpu.memory_space<vmem>>, vector<8x8xf32>
    tpu.vector_store %arg18[%c8_132, %c0_133], %212 {strides = array<i32>} : memref<32x8xf32, #tpu.memory_space<vmem>>, vector<8x8xf32>,
    %214 = vector.extract_strided_slice %197 {offsets = [0, 16], sizes = [8, 8], strides = [1, 1]} : vector<8x96xf32> to vector<8x8xf32>
    %cst_134 = arith.constant 0.353553385 : f32
    %215 = vector.broadcast %cst_134 : f32 to vector<8x8xf32>
    %216 = arith.mulf %214, %215 : vector<8x8xf32>
    %c16_135 = arith.constant 16 : index
    %c0_136 = arith.constant 0 : index
    %217 = vector.load %arg16[%c16_135, %c0_136] : memref<32x8xf32, #tpu.memory_space<vmem>>, vector<8x8xf32>
    tpu.vector_store %arg16[%c16_135, %c0_136], %216 {strides = array<i32>} : memref<32x8xf32, #tpu.memory_space<vmem>>, vector<8x8xf32>,
    %218 = vector.extract_strided_slice %197 {offsets = [0, 48], sizes = [8, 8], strides = [1, 1]} : vector<8x96xf32> to vector<8x8xf32>
    %c16_137 = arith.constant 16 : index
    %c0_138 = arith.constant 0 : index
    %219 = vector.load %arg17[%c16_137, %c0_138] : memref<32x8xf32, #tpu.memory_space<vmem>>, vector<8x8xf32>
    tpu.vector_store %arg17[%c16_137, %c0_138], %218 {strides = array<i32>} : memref<32x8xf32, #tpu.memory_space<vmem>>, vector<8x8xf32>,
    %220 = vector.extract_strided_slice %197 {offsets = [0, 80], sizes = [8, 8], strides = [1, 1]} : vector<8x96xf32> to vector<8x8xf32>
    %c16_139 = arith.constant 16 : index
    %c0_140 = arith.constant 0 : index
    %221 = vector.load %arg18[%c16_139, %c0_140] : memref<32x8xf32, #tpu.memory_space<vmem>>, vector<8x8xf32>
    tpu.vector_store %arg18[%c16_139, %c0_140], %220 {strides = array<i32>} : memref<32x8xf32, #tpu.memory_space<vmem>>, vector<8x8xf32>,
    %222 = vector.extract_strided_slice %197 {offsets = [0, 24], sizes = [8, 8], strides = [1, 1]} : vector<8x96xf32> to vector<8x8xf32>
    %cst_141 = arith.constant 0.353553385 : f32
    %223 = vector.broadcast %cst_141 : f32 to vector<8x8xf32>
    %224 = arith.mulf %222, %223 : vector<8x8xf32>
    %c24_142 = arith.constant 24 : index
    %c0_143 = arith.constant 0 : index
    %225 = vector.load %arg16[%c24_142, %c0_143] : memref<32x8xf32, #tpu.memory_space<vmem>>, vector<8x8xf32>
    tpu.vector_store %arg16[%c24_142, %c0_143], %224 {strides = array<i32>} : memref<32x8xf32, #tpu.memory_space<vmem>>, vector<8x8xf32>,
    %226 = vector.extract_strided_slice %197 {offsets = [0, 56], sizes = [8, 8], strides = [1, 1]} : vector<8x96xf32> to vector<8x8xf32>
    %c24_144 = arith.constant 24 : index
    %c0_145 = arith.constant 0 : index
    %227 = vector.load %arg17[%c24_144, %c0_145] : memref<32x8xf32, #tpu.memory_space<vmem>>, vector<8x8xf32>
    tpu.vector_store %arg17[%c24_144, %c0_145], %226 {strides = array<i32>} : memref<32x8xf32, #tpu.memory_space<vmem>>, vector<8x8xf32>,
    %228 = vector.extract_strided_slice %197 {offsets = [0, 88], sizes = [8, 8], strides = [1, 1]} : vector<8x96xf32> to vector<8x8xf32>
    %c24_146 = arith.constant 24 : index
    %c0_147 = arith.constant 0 : index
    %229 = vector.load %arg18[%c24_146, %c0_147] : memref<32x8xf32, #tpu.memory_space<vmem>>, vector<8x8xf32>
    tpu.vector_store %arg18[%c24_146, %c0_147], %228 {strides = array<i32>} : memref<32x8xf32, #tpu.memory_space<vmem>>, vector<8x8xf32>,
    %c0_148 = arith.constant 0 : index
    %c0_149 = arith.constant 0 : index
    %230 = vector.load %arg16[%c0_148, %c0_149] : memref<32x8xf32, #tpu.memory_space<vmem>>, vector<32x8xf32>
    %231 = arith.truncf %230 : vector<32x8xf32> to vector<32x8xbf16>
    %c0_150 = arith.constant 0 : index
    %c0_151 = arith.constant 0 : index
    %232 = vector.load %arg17[%c0_150, %c0_151] : memref<32x8xf32, #tpu.memory_space<vmem>>, vector<32x8xf32>
    %233 = arith.truncf %232 : vector<32x8xf32> to vector<32x8xbf16>
    %c0_152 = arith.constant 0 : index
    %c0_153 = arith.constant 0 : index
    %234 = vector.load %arg18[%c0_152, %c0_153] : memref<32x8xf32, #tpu.memory_space<vmem>>, vector<32x8xf32>
    %235 = arith.truncf %234 : vector<32x8xf32> to vector<32x8xbf16>
    %cst_154 = arith.constant dense<0.000000e+00> : vector<32x32xf32>
    %236 = tpu.matmul %231, %233, %cst_154 {dimension_numbers = #tpu.dot_dimension_numbers<[1], [1], [0], [0], [0, 0, 1, 0], [], []>} : vector<32x8xbf16>, vector<32x8xbf16>, vector<32x32xf32> -> vector<32x32xf32>
    %237 = arith.addf %236, %1 : vector<32x32xf32>
    %cst_155 = arith.constant dense<0xFF800000> : vector<32xf32>
    %238 = vector.multi_reduction <maximumf>, %237, %cst_155 [1] : vector<32x32xf32> to vector<32xf32>
    %239 = vector.shape_cast %238 : vector<32xf32> to vector<32x1xf32>
    %240 = vector.broadcast %239 : vector<32x1xf32> to vector<32x32xf32>
    %241 = arith.subf %237, %240 : vector<32x32xf32>
    %242 = math.exp %241 : vector<32x32xf32>
    %cst_156 = arith.constant dense<0.000000e+00> : vector<32xf32>
    %243 = vector.multi_reduction <add>, %242, %cst_156 [1] : vector<32x32xf32> to vector<32xf32>
    %244 = vector.shape_cast %243 : vector<32xf32> to vector<32x1xf32>
    %245 = arith.truncf %242 : vector<32x32xf32> to vector<32x32xbf16>
    %cst_157 = arith.constant dense<0.000000e+00> : vector<32x8xf32>
    %246 = tpu.matmul %245, %235, %cst_157 {dimension_numbers = #tpu.dot_dimension_numbers<[1], [0], [0], [1], [0, 0, 1, 1], [], []>} : vector<32x32xbf16>, vector<32x8xbf16>, vector<32x8xf32> -> vector<32x8xf32>
    %247 = tpu.reciprocal %244 {approx = true} : vector<32x1xf32> -> vector<32x1xf32>
    %248 = vector.broadcast %247 : vector<32x1xf32> to vector<32x8xf32>
    %249 = arith.mulf %246, %248 : vector<32x8xf32>
    %250 = vector.extract_strided_slice %249 {offsets = [0, 0], sizes = [8, 8], strides = [1, 1]} : vector<32x8xf32> to vector<8x8xf32>
    %c0_158 = arith.constant 0 : index
    %c0_159 = arith.constant 0 : index
    %251 = vector.load %arg19[%c0_158, %c0_159] : memref<8x32xf32, #tpu.memory_space<vmem>>, vector<8x8xf32>
    tpu.vector_store %arg19[%c0_158, %c0_159], %250 {strides = array<i32>} : memref<8x32xf32, #tpu.memory_space<vmem>>, vector<8x8xf32>,
    %252 = vector.extract_strided_slice %249 {offsets = [8, 0], sizes = [8, 8], strides = [1, 1]} : vector<32x8xf32> to vector<8x8xf32>
    %c0_160 = arith.constant 0 : index
    %c8_161 = arith.constant 8 : index
    %253 = vector.load %arg19[%c0_160, %c8_161] : memref<8x32xf32, #tpu.memory_space<vmem>>, vector<8x8xf32>
    tpu.vector_store %arg19[%c0_160, %c8_161], %252 {strides = array<i32>} : memref<8x32xf32, #tpu.memory_space<vmem>>, vector<8x8xf32>,
    %254 = vector.extract_strided_slice %249 {offsets = [16, 0], sizes = [8, 8], strides = [1, 1]} : vector<32x8xf32> to vector<8x8xf32>
    %c0_162 = arith.constant 0 : index
    %c16_163 = arith.constant 16 : index
    %255 = vector.load %arg19[%c0_162, %c16_163] : memref<8x32xf32, #tpu.memory_space<vmem>>, vector<8x8xf32>
    tpu.vector_store %arg19[%c0_162, %c16_163], %254 {strides = array<i32>} : memref<8x32xf32, #tpu.memory_space<vmem>>, vector<8x8xf32>,
    %256 = vector.extract_strided_slice %249 {offsets = [24, 0], sizes = [8, 8], strides = [1, 1]} : vector<32x8xf32> to vector<8x8xf32>
    %c0_164 = arith.constant 0 : index
    %c24_165 = arith.constant 24 : index
    %257 = vector.load %arg19[%c0_164, %c24_165] : memref<8x32xf32, #tpu.memory_space<vmem>>, vector<8x8xf32>
    tpu.vector_store %arg19[%c0_164, %c24_165], %256 {strides = array<i32>} : memref<8x32xf32, #tpu.memory_space<vmem>>, vector<8x8xf32>,
    %c0_166 = arith.constant 0 : index
    %c0_167 = arith.constant 0 : index
    %258 = vector.load %arg19[%c0_166, %c0_167] : memref<8x32xf32, #tpu.memory_space<vmem>>, vector<8x32xf32>
    %259 = arith.truncf %258 : vector<8x32xf32> to vector<8x32xbf16>
    %c1_168 = arith.constant 1 : index
    %c0_169 = arith.constant 0 : index
    %c0_170 = arith.constant 0 : index
    %260 = vector.load %arg7[%c1_168, %c0_169, %c0_170] : memref<2x32x32xbf16, #tpu.memory_space<vmem>>, vector<1x32x32xbf16>
    %261 = vector.shape_cast %260 : vector<1x32x32xbf16> to vector<32x32xbf16>
    %cst_171 = arith.constant dense<0.000000e+00> : vector<8x32xf32>
    %262 = tpu.matmul %259, %261, %cst_171 {dimension_numbers = #tpu.dot_dimension_numbers<[1], [0], [0], [1], [0, 0, 1, 1], [], []>} : vector<8x32xbf16>, vector<32x32xbf16>, vector<8x32xf32> -> vector<8x32xf32>
    %c1_172 = arith.constant 1 : index
    %c0_173 = arith.constant 0 : index
    %c0_174 = arith.constant 0 : index
    %263 = vector.load %arg8[%c1_172, %c0_173, %c0_174] : memref<2x1x32xf32, #tpu.memory_space<vmem>>, vector<1x1x32xf32>
    %264 = vector.shape_cast %263 : vector<1x1x32xf32> to vector<1x32xf32>
    %265 = vector.broadcast %264 : vector<1x32xf32> to vector<8x32xf32>
    %266 = arith.addf %262, %265 : vector<8x32xf32>
    %267 = arith.addf %163, %266 : vector<8x32xf32>
    %cst_175 = arith.constant dense<0.000000e+00> : vector<8xf32>
    %268 = vector.multi_reduction <add>, %267, %cst_175 [1] : vector<8x32xf32> to vector<8xf32>
    %269 = vector.shape_cast %268 : vector<8xf32> to vector<8x1xf32>
    %cst_176 = arith.constant 3.200000e+01 : f32
    %270 = vector.broadcast %cst_176 : f32 to vector<8x1xf32>
    %271 = arith.divf %269, %270 : vector<8x1xf32>
    %272 = vector.broadcast %271 : vector<8x1xf32> to vector<8x32xf32>
    %273 = arith.subf %267, %272 : vector<8x32xf32>
    %274 = arith.mulf %273, %273 : vector<8x32xf32>
    %cst_177 = arith.constant dense<0.000000e+00> : vector<8xf32>
    %275 = vector.multi_reduction <add>, %274, %cst_177 [1] : vector<8x32xf32> to vector<8xf32>
    %276 = vector.shape_cast %275 : vector<8xf32> to vector<8x1xf32>
    %cst_178 = arith.constant 3.200000e+01 : f32
    %277 = vector.broadcast %cst_178 : f32 to vector<8x1xf32>
    %278 = arith.divf %276, %277 : vector<8x1xf32>
    %279 = vector.broadcast %271 : vector<8x1xf32> to vector<8x32xf32>
    %280 = arith.subf %267, %279 : vector<8x32xf32>
    %cst_179 = arith.constant 9.99999974E-6 : f32
    %281 = vector.broadcast %cst_179 : f32 to vector<8x1xf32>
    %282 = arith.addf %278, %281 : vector<8x1xf32>
    %283 = math.rsqrt %282 : vector<8x1xf32>
    %284 = vector.broadcast %283 : vector<8x1xf32> to vector<8x32xf32>
    %285 = arith.mulf %280, %284 : vector<8x32xf32>
    %c1_180 = arith.constant 1 : index
    %c0_181 = arith.constant 0 : index
    %c0_182 = arith.constant 0 : index
    %286 = vector.load %arg9[%c1_180, %c0_181, %c0_182] : memref<2x1x32xf32, #tpu.memory_space<vmem>>, vector<1x1x32xf32>
    %287 = vector.shape_cast %286 : vector<1x1x32xf32> to vector<1x32xf32>
    %288 = vector.broadcast %287 : vector<1x32xf32> to vector<8x32xf32>
    %289 = arith.mulf %285, %288 : vector<8x32xf32>
    %c1_183 = arith.constant 1 : index
    %c0_184 = arith.constant 0 : index
    %c0_185 = arith.constant 0 : index
    %290 = vector.load %arg10[%c1_183, %c0_184, %c0_185] : memref<2x1x32xf32, #tpu.memory_space<vmem>>, vector<1x1x32xf32>
    %291 = vector.shape_cast %290 : vector<1x1x32xf32> to vector<1x32xf32>
    %292 = vector.broadcast %291 : vector<1x32xf32> to vector<8x32xf32>
    %293 = arith.addf %289, %292 : vector<8x32xf32>
    %294 = arith.truncf %293 : vector<8x32xf32> to vector<8x32xbf16>
    %c1_186 = arith.constant 1 : index
    %c0_187 = arith.constant 0 : index
    %c0_188 = arith.constant 0 : index
    %295 = vector.load %arg11[%c1_186, %c0_187, %c0_188] : memref<2x32x128xbf16, #tpu.memory_space<vmem>>, vector<1x32x128xbf16>
    %296 = vector.shape_cast %295 : vector<1x32x128xbf16> to vector<32x128xbf16>
    %cst_189 = arith.constant dense<0.000000e+00> : vector<8x128xf32>
    %297 = tpu.matmul %294, %296, %cst_189 {dimension_numbers = #tpu.dot_dimension_numbers<[1], [0], [0], [1], [0, 0, 1, 1], [], []>} : vector<8x32xbf16>, vector<32x128xbf16>, vector<8x128xf32> -> vector<8x128xf32>
    %c1_190 = arith.constant 1 : index
    %c0_191 = arith.constant 0 : index
    %c0_192 = arith.constant 0 : index
    %298 = vector.load %arg12[%c1_190, %c0_191, %c0_192] : memref<2x1x128xf32, #tpu.memory_space<vmem>>, vector<1x1x128xf32>
    %299 = vector.shape_cast %298 : vector<1x1x128xf32> to vector<1x128xf32>
    %300 = vector.broadcast %299 : vector<1x128xf32> to vector<8x128xf32>
    %301 = arith.addf %297, %300 : vector<8x128xf32>
    %302 = arith.mulf %301, %301 : vector<8x128xf32>
    %303 = arith.mulf %301, %302 : vector<8x128xf32>
    %cst_193 = arith.constant 4.471500e-02 : f32
    %304 = vector.broadcast %cst_193 : f32 to vector<8x128xf32>
    %305 = arith.mulf %304, %303 : vector<8x128xf32>
    %306 = arith.addf %301, %305 : vector<8x128xf32>
    %cst_194 = arith.constant 0.797884583 : f32
    %307 = vector.broadcast %cst_194 : f32 to vector<8x128xf32>
    %308 = arith.mulf %307, %306 : vector<8x128xf32>
    %309 = math.tanh %308 : vector<8x128xf32>
    %cst_195 = arith.constant 1.000000e+00 : f32
    %310 = vector.broadcast %cst_195 : f32 to vector<8x128xf32>
    %311 = arith.addf %310, %309 : vector<8x128xf32>
    %cst_196 = arith.constant 5.000000e-01 : f32
    %312 = vector.broadcast %cst_196 : f32 to vector<8x128xf32>
    %313 = arith.mulf %312, %311 : vector<8x128xf32>
    %314 = arith.mulf %301, %313 : vector<8x128xf32>
    %315 = arith.truncf %314 : vector<8x128xf32> to vector<8x128xbf16>
    %c1_197 = arith.constant 1 : index
    %c0_198 = arith.constant 0 : index
    %c0_199 = arith.constant 0 : index
    %316 = vector.load %arg13[%c1_197, %c0_198, %c0_199] : memref<2x128x32xbf16, #tpu.memory_space<vmem>>, vector<1x128x32xbf16>
    %317 = vector.shape_cast %316 : vector<1x128x32xbf16> to vector<128x32xbf16>
    %cst_200 = arith.constant dense<0.000000e+00> : vector<8x32xf32>
    %318 = tpu.matmul %315, %317, %cst_200 {dimension_numbers = #tpu.dot_dimension_numbers<[1], [0], [0], [1], [0, 0, 1, 1], [], []>} : vector<8x128xbf16>, vector<128x32xbf16>, vector<8x32xf32> -> vector<8x32xf32>
    %c1_201 = arith.constant 1 : index
    %c0_202 = arith.constant 0 : index
    %c0_203 = arith.constant 0 : index
    %319 = vector.load %arg14[%c1_201, %c0_202, %c0_203] : memref<2x1x32xf32, #tpu.memory_space<vmem>>, vector<1x1x32xf32>
    %320 = vector.shape_cast %319 : vector<1x1x32xf32> to vector<1x32xf32>
    %321 = vector.broadcast %320 : vector<1x32xf32> to vector<8x32xf32>
    %322 = arith.addf %318, %321 : vector<8x32xf32>
    %323 = arith.addf %267, %322 : vector<8x32xf32>
    %c0_204 = arith.constant 0 : index
    %c0_205 = arith.constant 0 : index
    %c0_206 = arith.constant 0 : index
    %324 = vector.load %arg15[%c0_204, %c0_205, %c0_206] : memref<1x8x32xf32, #tpu.memory_space<vmem>>, vector<1x8x32xf32>
    %325 = vector.shape_cast %324 : vector<1x8x32xf32> to vector<8x32xf32>
    %326 = vector.shape_cast %323 : vector<8x32xf32> to vector<1x8x32xf32>
    tpu.vector_store %arg15[%c0_204, %c0_205, %c0_206], %326 {strides = array<i32>} : memref<1x8x32xf32, #tpu.memory_space<vmem>>, vector<1x8x32xf32>,
    return
  }
  func.func @transform_0(%arg0: i32) -> (i32, i32, i32) {
    %c0_i32 = arith.constant 0 : i32
    %c0_i32_0 = arith.constant 0 : i32
    %c0_i32_1 = arith.constant 0 : i32
    return %arg0, %c0_i32, %c0_i32_0 : i32, i32, i32
  }
  func.func @transform_1(%arg0: i32) -> (i32, i32, i32) {
    %c0_i32 = arith.constant 0 : i32
    %c0_i32_0 = arith.constant 0 : i32
    %c0_i32_1 = arith.constant 0 : i32
    return %arg0, %c0_i32, %c0_i32_0 : i32, i32, i32
  }
  func.func @transform_2(%arg0: i32) -> (i32, i32, i32) {
    %c0_i32 = arith.constant 0 : i32
    %c0_i32_0 = arith.constant 0 : i32
    %c0_i32_1 = arith.constant 0 : i32
    %c0_i32_2 = arith.constant 0 : i32
    return %c0_i32, %c0_i32_0, %c0_i32_1 : i32, i32, i32
  }
  func.func @transform_3(%arg0: i32) -> (i32, i32, i32) {
    %c0_i32 = arith.constant 0 : i32
    %c0_i32_0 = arith.constant 0 : i32
    %c0_i32_1 = arith.constant 0 : i32
    %c0_i32_2 = arith.constant 0 : i32
    return %c0_i32, %c0_i32_0, %c0_i32_1 : i32, i32, i32
  }
  func.func @transform_4(%arg0: i32) -> (i32, i32, i32) {
    %c0_i32 = arith.constant 0 : i32
    %c0_i32_0 = arith.constant 0 : i32
    %c0_i32_1 = arith.constant 0 : i32
    %c0_i32_2 = arith.constant 0 : i32
    return %c0_i32, %c0_i32_0, %c0_i32_1 : i32, i32, i32
  }
  func.func @transform_5(%arg0: i32) -> (i32, i32, i32) {
    %c0_i32 = arith.constant 0 : i32
    %c0_i32_0 = arith.constant 0 : i32
    %c0_i32_1 = arith.constant 0 : i32
    %c0_i32_2 = arith.constant 0 : i32
    return %c0_i32, %c0_i32_0, %c0_i32_1 : i32, i32, i32
  }
  func.func @transform_6(%arg0: i32) -> (i32, i32, i32) {
    %c0_i32 = arith.constant 0 : i32
    %c0_i32_0 = arith.constant 0 : i32
    %c0_i32_1 = arith.constant 0 : i32
    %c0_i32_2 = arith.constant 0 : i32
    return %c0_i32, %c0_i32_0, %c0_i32_1 : i32, i32, i32
  }
  func.func @transform_7(%arg0: i32) -> (i32, i32, i32) {
    %c0_i32 = arith.constant 0 : i32
    %c0_i32_0 = arith.constant 0 : i32
    %c0_i32_1 = arith.constant 0 : i32
    %c0_i32_2 = arith.constant 0 : i32
    return %c0_i32, %c0_i32_0, %c0_i32_1 : i32, i32, i32
  }
  func.func @transform_8(%arg0: i32) -> (i32, i32, i32) {
    %c0_i32 = arith.constant 0 : i32
    %c0_i32_0 = arith.constant 0 : i32
    %c0_i32_1 = arith.constant 0 : i32
    %c0_i32_2 = arith.constant 0 : i32
    return %c0_i32, %c0_i32_0, %c0_i32_1 : i32, i32, i32
  }
  func.func @transform_9(%arg0: i32) -> (i32, i32, i32) {
    %c0_i32 = arith.constant 0 : i32
    %c0_i32_0 = arith.constant 0 : i32
    %c0_i32_1 = arith.constant 0 : i32
    %c0_i32_2 = arith.constant 0 : i32
    return %c0_i32, %c0_i32_0, %c0_i32_1 : i32, i32, i32
  }
  func.func @transform_10(%arg0: i32) -> (i32, i32, i32) {
    %c0_i32 = arith.constant 0 : i32
    %c0_i32_0 = arith.constant 0 : i32
    %c0_i32_1 = arith.constant 0 : i32
    %c0_i32_2 = arith.constant 0 : i32
    return %c0_i32, %c0_i32_0, %c0_i32_1 : i32, i32, i32
  }
  func.func @transform_11(%arg0: i32) -> (i32, i32, i32) {
    %c0_i32 = arith.constant 0 : i32
    %c0_i32_0 = arith.constant 0 : i32
    %c0_i32_1 = arith.constant 0 : i32
    %c0_i32_2 = arith.constant 0 : i32
    return %c0_i32, %c0_i32_0, %c0_i32_1 : i32, i32, i32
  }
  func.func @transform_12(%arg0: i32) -> (i32, i32, i32) {
    %c0_i32 = arith.constant 0 : i32
    %c0_i32_0 = arith.constant 0 : i32
    %c0_i32_1 = arith.constant 0 : i32
    %c0_i32_2 = arith.constant 0 : i32
    return %c0_i32, %c0_i32_0, %c0_i32_1 : i32, i32, i32
  }
  func.func @transform_13(%arg0: i32) -> (i32, i32, i32) {
    %c0_i32 = arith.constant 0 : i32
    %c0_i32_0 = arith.constant 0 : i32
    %c0_i32_1 = arith.constant 0 : i32
    %c0_i32_2 = arith.constant 0 : i32
    return %c0_i32, %c0_i32_0, %c0_i32_1 : i32, i32, i32
  }
  func.func @transform_14(%arg0: i32) -> (i32, i32, i32) {
    %c0_i32 = arith.constant 0 : i32
    %c0_i32_0 = arith.constant 0 : i32
    %c0_i32_1 = arith.constant 0 : i32
    return %arg0, %c0_i32, %c0_i32_0 : i32, i32, i32
  }
}

</mosaic_0001>

<bundles_post_ra>
// kernel: _decoder_stack_forward.1
= control target key start
LH: loop header
LB: loop body
LE: loop exit
PB: predicated region body
PF: predicated region fallthrough
CT: control target
= control target key end

     0   :  { %s2844_s0 = inlined_call_operand.hbm [shape: f32[2,8,32], index: 0, kind: input, shape index: {}]   ;;  %s2845_s1 = inlined_call_operand.vmem [shape: f32[2,32,32], index: 1, kind: input, shape index: {}]   ;;  %s2846_s2 = inlined_call_operand.vmem [shape: f32[2,1,32], index: 2, kind: input, shape index: {}]   ;;  %s2847_s3 = inlined_call_operand.vmem [shape: f32[2,1,32], index: 3, kind: input, shape index: {}]   ;;  %s2848_s4 = inlined_call_operand.vmem [shape: bf16[2,32,96], index: 4, kind: input, shape index: {}]   ;;  %s2849_s5 = inlined_call_operand.hbm [shape: f32[2,1,96], index: 5, kind: input, shape index: {}]   ;;  %s2850_s6 = inlined_call_operand.vmem [shape: bf16[2,32,32], index: 6, kind: input, shape index: {}]   ;;  %s2851_s7 = inlined_call_operand.hbm [shape: f32[2,1,32], index: 7, kind: input, shape index: {}]   ;;  %s2852_s8 = inlined_call_operand.vmem [shape: f32[2,1,32], index: 8, kind: input, shape index: {}]   ;;  %s2853_s9 = inlined_call_operand.hbm [shape: f32[2,1,32], index: 9, kind: input, shape index: {}]   ;;  %s2854_s10 = inlined_call_operand.vmem [shape: bf16[2,32,128], index: 10, kind: input, shape index: {}]   ;;  %s2855_s11 = inlined_call_operand.hbm [shape: f32[2,1,128], index: 11, kind: input, shape index: {}]   ;;  %s2856_s12 = inlined_call_operand.vmem [shape: bf16[2,128,32], index: 12, kind: input, shape index: {}]   ;;  %s2857_s13 = inlined_call_operand.hbm [shape: f32[2,1,32], index: 13, kind: input, shape index: {}]   ;;  %s2858_s14 = inlined_call_operand.hbm [shape: f32[2,8,32], index: 14, kind: output, shape index: {}]  }
   0x1   :  { %2875 = sst [smem:[#allocation23_spill]] %s2849_s5 }
   0x2   :  { %2876 = sst [smem:[#allocation24_spill]] %s2851_s7 }
   0x3   :  { %2877 = sst [smem:[#allocation25_spill]] %s2852_s8 }
   0x4   :  { %2878 = sst [smem:[#allocation26_spill]] %s2853_s9 }
   0x5   :  { %2879 = sst [smem:[#allocation27_spill]] %s2855_s11 }
   0x6   :  { %2880 = sst [smem:[#allocation28_spill]] %s2856_s12 }
   0x7   :  { %2881 = sst [smem:[#allocation29_spill]] %s2857_s13 }
   0x8   :  { %2882 = sst [smem:[#allocation30_spill]] %s2858_s14 }
   0x9   :  { %19 = vsyncpa [#allocation7], 0 }
   0xa   :  { %21 = vsyncpa [#allocation7 + $0x1], 0 }
   0xb   :  { %22 = vsyncpa [#allocation10], 0 }
   0xc   :  { %23 = vsyncpa [#allocation13], 0 }
   0xd   :  { %24 = vsyncpa [#allocation16], 0 }
   0xe   :  { %25 = vsyncpa [#allocation8], 0 }
   0xf   :  { %27 = vsyncpa [#allocation8 + $0x1], 0  ;;  %s2414_s29 = smov 0   ;;  %s2416_s30 = smov 0  }
  0x10   :  { %s2418_s15 = smov 0   ;;  %s2420_s16 = smov 0  }
  0x11 LB: > { %s2883_s5 = sld [smem:[#allocation23_spill]]  ;;  %s2438_s20 = sadd.s32 4294967295, %s2315_s16   ;;  %s2315_s16 = sphi %s2420_s16, %s2914_s16   ;;  %s2311_s15 = sphi %s2418_s15, %s2913_s15   ;;  %s2307_s30 = sphi %s2416_s30, %s2912_s30   ;;  %s2303_s29 = sphi %s2414_s29, %s2911_s29  }
  0x12   : > { %p1672_p0 = scmp.ge.s32.totalorder %s2315_s16, 1  ;;  %p54_p1 = scmp.eq.s32.totalorder %s2438_s20, 0 }
  0x13   : > { %p368_p2 = scmp.lt.s32.totalorder %s2315_s16, 3  ;;  %s2317_s22 = smov [#allocation9]  }
  0x14   : > { %s390_s23 = sshll.u32 %s2317_s22, 4  ;;  %s2885_s9 = sld [smem:[#allocation26_spill]]  ;;  %s391_s23 = int_to_ptr.vmem [resolvable:$true] %s390_s23 }
  0x15   : > { %p2443_p3 = pnand %p1672_p0, %p368_p2  ;;  %s2887_s7 = sld [smem:[#allocation24_spill]] }
  0x16   : > { %s2318_s22 = smov [#allocation12]   ;;  %s2319_s14 = smov 16  }
  0x17   : > { %s388_s19 = sshll.u32 %s2883_s5, 4  ;;  %p1905_p4 = pneg %p2443_p3  ;;  %s389_s19 = int_to_ptr.hbm [resolvable:$true] %s388_s19 }
  0x18   : > { %s424_s5 = sshll.u32 %s2318_s22, 4  ;;  %s2320_s8 = smov 1   ;;  %s425_s5 = int_to_ptr.vmem [resolvable:$true] %s424_s5 }
  0x19   : > { %p2455_p6 = pnand %p1905_p4, %p54_p1  ;;  %s2888_s11 = sld [smem:[#allocation27_spill]] }
  0x1a   : > { %s422_s26 = sshll.u32 %s2885_s9, 4  ;;  %s2321_s12 = smov [#allocation11]   ;;  %s423_s26 = int_to_ptr.hbm [resolvable:$true] %s422_s26 }
  0x1b   : > { %s405_s18 = sshll.u32 %s2887_s7, 4  ;;  %s407_s28 = sshll.u32 %s2321_s12, 4  ;;  %s406_s18 = int_to_ptr.hbm [resolvable:$true] %s405_s18  ;;  %s408_s28 = int_to_ptr.vmem [resolvable:$true] %s407_s28 }
  0x1c   : > { %1908 = dma.hbm_to_vmem [thread:$0]  (!%p2455_p6), %s389_s19, 32, %s391_s23, [#allocation10], %s2319_s14, %s2319_s14, %s2320_s8  }
  0x1d   : > { %1914 = dma.hbm_to_vmem [thread:$0]  (!%p2455_p6), %s423_s26, 32, %s425_s5, [#allocation13], %s2319_s14, %s2319_s14, %s2320_s8  }
  0x1e   : > { %1911 = dma.hbm_to_vmem [thread:$0]  (!%p2455_p6), %s406_s18, 32, %s408_s28, [#allocation10], %s2319_s14, %s2319_s14, %s2320_s8  }
  0x1f   : > { %s439_s9 = sshll.u32 %s2888_s11, 4  ;;  %s2322_s19 = smov [#allocation14]   ;;  %s440_s9 = int_to_ptr.hbm [resolvable:$true] %s439_s9 }
  0x20   : > { %s441_s5 = sshll.u32 %s2322_s19, 4  ;;  %s2889_s13 = sld [smem:[#allocation29_spill]]  ;;  %s442_s5 = int_to_ptr.vmem [resolvable:$true] %s441_s5 }
  0x21   : > { %1917 = dma.hbm_to_vmem [thread:$0]  (!%p2455_p6), %s440_s9, 32, %s442_s5, [#allocation13], %s2319_s14, %s2319_s14, %s2320_s8  }
  0x22   : > { %s2323_s12 = smov [#allocation15]   ;;  %s1671_s18 = sadd.s32 4294967294, %s2315_s16  }
  0x23   : > { %s458_s22 = sshll.u32 %s2323_s12, 4  ;;  %s2480_s24 = sadd.s32 1, %s2315_s16   ;;  %s459_s22 = int_to_ptr.vmem [resolvable:$true] %s458_s22 }
  0x24   : > { %s40_s25 = sadd.s32 1, %s2311_s15  ;;  %s37_s28 = ssub.s32 %s2315_s16, %s2480_s24 }
  0x25   : > { %p47_p7 = scmp.ne.s32.totalorder %s2311_s15, %s2307_s30  ;;  %p38_p8 = scmp.eq.s32.totalorder %s37_s28, 0 }
  0x26   : > { %s456_s17 = sshll.u32 %s2889_s13, 4  ;;  %p48_p9 = scmp.eq.s32.totalorder %s2315_s16, 0  ;;  %s457_s17 = int_to_ptr.hbm [resolvable:$true] %s456_s17 }
  0x27   : > { %1920 = dma.hbm_to_vmem [thread:$0]  (!%p2455_p6), %s457_s17, 32, %s459_s22, [#allocation16], %s2319_s14, %s2319_s14, %s2320_s8  }
  0x28   : > { %p53_p10 = scmp.ne.s32.totalorder %s2307_s30, %s2303_s29  ;;  %p355_p11 = scmp.eq.s32.totalorder %s2438_s20, 1 }
  0x29   : > { %s2492_s9 = scalar_select %p38_p8, %s2311_s15, %s40_s25  }
  0x2a   : > { %p2496_p12 = por %p54_p1, %p53_p10  ;;  %p2500_p13 = por %p355_p11, %p47_p7 }
  0x2b   : > { %p361_p0 = scmp.eq.s32.totalorder %s1671_s18, 1  ;;  %p49_p2 = por %p48_p9, %p47_p7 }
  0x2c   : > { %s472_s14 = sand.u32 1, %s2311_s15   ;;  %p1934_p6 = scmp.lt.s32.totalorder %s2315_s16, 2 }
  0x2d   : > { %p2505_p4 = por %p361_p0, %p53_p10  ;;  %s1679_s5 = sshll.u32 %s472_s14, 3 }
  0x2e   : > { %s1680_s23 = sshll.u32 %s2315_s16, 3  ;;  %s476_s25 = scalar_lea.vmem [#allocation6], %s1679_s5 }
  0x2f   : > { %s480_s12 = scalar_lea.hbm %s2844_s0, %s1680_s23  ;;  %s484_s28 = sshll.u32 %s476_s25, 4  ;;  %s485_s28 = int_to_ptr.vmem [resolvable:$true] %s484_s28 }
  0x30   : > { %s482_s22 = sshll.u32 %s480_s12, 4  ;;  %p2514_p8 = pnand %p1934_p6, %p49_p2  ;;  %s483_s22 = int_to_ptr.hbm [resolvable:$true] %s482_s22 }
  0x31   : > { %s473_s7 = scalar_lea.sflag [#allocation7], %s472_s14  ;;  %s2207_s11 = sshra.s32 %s483_s22, 4  ;;  %s2208_s11 = int_to_ptr.hbm [resolvable:$true] %s2207_s11 }
  0x32   : > { %s2209_s13 = scalar_lea.hbm %s2208_s11, 8  ;;  %p2211_p9 = pneg %p2514_p8 }
  0x33   : > { %p2210_p7 = scmp.ne.s32.totalorder %s2208_s11, %s2209_s13  ;;  %s2214_s5 = scalar_lea.hbm %s2844_s0, 16 }
  0x34   : > { %p2215_p0 = scmp.lt.s32.totalorder %s2208_s11, %s2844_s0  ;;  %p2216_p2 = scmp.lt.s32.totalorder %s2214_s5, %s2209_s13 }
  0x35   : > { %p2212_p10 = pnand %p2211_p9, %p2210_p7 }
  0x36   : > { %p2217_p6 = por %p2216_p2, %p2215_p0 }
  0x37   : > { %p2213_p11 = pneg %p2212_p10 }
  0x39   : > { %p2218_p5 = pnand %p2217_p6, %p2213_p11 }
  0x3b   : > { %2221 = shalt.err (!%p2218_p5)
}
  0x3c   : > { %1924 = dma.hbm_to_vmem [thread:$0]  (!%p2514_p8), %s483_s22, 128, %s485_s28, %s473_s7  }
  0x3d   : > { %501 = sbr.rel (%p2443_p3) target bundleno = 3646 (0xe3e), region = 76  ;;  %s2531_s14 = sand.u32 (!%p2443_p3), 1, %s2307_s30  }
  0x3e   : > { %s2862_s25 = sshll.u32 (!%p2443_p3), %s2531_s14, 3  ;;  %s504_s23 = scalar_lea.sflag (!%p2443_p3), [#allocation7], %s2531_s14 }
  0x3f   : > { %s507_s11 = scalar_lea.vmem (!%p2443_p3), [#allocation6], %s2862_s25 }
  0x42   : > { %2282 = dma.done.wait (%p2496_p12), %s504_s23, 128  }
  0x43   : > { %2284 = vsyncadd (%p2496_p12), %s504_s23, 4294967168 }
  0x44   : > { %2286 = dma.done.wait (%p54_p1), [#allocation10], 64  }
  0x45   : > { %2288 = vsyncadd (%p54_p1), [#allocation10], 4294967232 }
  0x46   : > { %2290 = dma.done.wait (%p54_p1), [#allocation13], 64  }
  0x47   : > { %2292 = vsyncadd (%p54_p1), [#allocation13], 4294967232 }
  0x48   : > { %2294 = dma.done.wait (%p54_p1), [#allocation16], 32  }
  0x49   : > { %2296 = vsyncadd (%p54_p1), [#allocation16], 4294967264  ;;  %vm594_vm0 = vcmask 261120   ;;  %v2553_v0 = vld [vmem:[%s507_s11] sm:$0xff]  ;;  %v2324_v2 = vmov 32.0   ;;  %v1853_v15 = vld [vmem:[%s2848_s4] sm:$0xff] }
  0x4a   : > { %v595_v1 = vsel %vm594_vm0, %v2553_v0, 0.0  ;;  %2011 = vrcp.f32 %v2324_v2  ;;  %v1854_v14 = vld [vmem:[%s2848_s4 + $0x8] sm:$0xff]  ;;  %v1995_v25 = vld [vmem:[%s2846_s2] ss:$0 sm:$0xff]  ;;  %v1997_v32 = vld [vmem:[#allocation9] ss:$0 sm:$0xff] }
  0x4b   : > { %596 = vadd.xlane.f32.xlu0 %v595_v1  ;;  %664 = vmatpush.bf16.msra.mxu1 %v1854_v14  ;;  %v1996_v28 = vld [vmem:[%s2847_s3] ss:$0 sm:$0xff]  ;;  %vm672_vm5 = vcmask 64512   ;;  %s2325_s5 = smov 96   ;;  %s2874_s17 = smov 80   ;;  %vm845_vm6 = vcmask 130112  }
  0x4c   : > { %s2872_s12 = smov 120   ;;  %s2871_s23 = smov 88   ;;  %vm851_vm7 = vcmask 195712   ;;  %vm857_vm8 = vcmask 261312  }
  0x4d   : > { %s2329_s11 = smov 72   ;;  %s2864_s7 = smov 64  }
  0x4e   : > { %s2866_s13 = smov 104   ;;  %s2873_s21 = smov 112  }
  0x4f   : > { %665 = vmatpush.bf16.msra.mxu1 %v1853_v15  ;;  %s2863_s27 = smov 56   ;;  %s2870_s22 = smov 40  }
  0x50   : > { %v2012_v3 = vpop.eup %2011  ;;  %s2869_s28 = smov 48   ;;  %p583_p1 = scmp.lt.s32.totalorder %s2438_s20, 1 }
  0x51   : > { %v599_v4 = vmul.f32 32.0, %v2012_v3  ;;  %vm603_vm1 = vweird.f32 %v2012_v3  ;;  %s2865_s25 = smov 8  }
  0x52   : > { %s584_s18 = scalar_select %p583_p1, %s2438_s20, 1 }
  0x53   : > { %v600_v5 = vsub.f32 1.0, %v599_v4 }
  0x54   : > { %s1852_s26 = sshll.u32 %s584_s18, 5  ;;  %s2895_s18 = sld [smem:[#allocation25_spill]] }
  0x55   : > { %v601_v6 = vmul.f32 %v2012_v3, %v600_v5 }
  0x57   : > { %v602_v7 = vadd.f32 %v2012_v3, %v601_v6 }
  0x59   : > { %v2557_v8 = vsel %vm603_vm1, %v2012_v3, %v602_v7 }
  0xbe   : > { %v597_v9 = vpop.xlane.xlu0 %596 }
  0xbf   : > { %v605_v10 = vmul.f32 %v2557_v8, %v597_v9 }
  0xc1   : > { %v606_v11 = vsub.f32 %v2553_v0, %v605_v10 }
  0xc3   : > { %v607_v12 = vmul.f32 %v606_v11, %v606_v11 }
  0xc5   : > { %v608_v13 = vsel %vm594_vm0, %v607_v12, 0.0 }
  0xc6   : > { %609 = vadd.xlane.f32.xlu0 %v608_v13 }
 0x139   : > { %v610_v16 = vpop.xlane.xlu0 %609 }
 0x13a   : > { %v611_v17 = vmul.f32 %v610_v16, %v2557_v8 }
 0x13c   : > { %v612_v18 = vadd.f32 1e-05, %v611_v17 }
 0x13e   : > { %2013 = vrsqrt.f32 %v612_v18  ;;  %vm619_vm3 = vweird.f32 %v612_v18 }
 0x144   : > { %v2014_v19 = vpop.eup %2013 }
 0x145   : > { %v614_v20 = vmul.f32 %v2014_v19, %v612_v18  ;;  %vm620_vm2 = vweird.f32 %v2014_v19 }
 0x146   : > { %vm621_vm4 = vmor %vm619_vm3, %vm620_vm2 }
 0x147   : > { %v615_v21 = vmul.f32 %v2014_v19, %v614_v20 }
 0x149   : > { %v616_v22 = vmul.f32 0.5, %v615_v21 }
 0x14b   : > { %v617_v23 = vsub.f32 1.5, %v616_v22 }
 0x14d   : > { %v618_v24 = vmul.f32 %v2014_v19, %v617_v23 }
 0x14f   : > { %v622_v26 = vsel %vm621_vm4, %v2014_v19, %v618_v24 }
 0x150   : > { %v623_v27 = vmul.f32 %v622_v26, %v606_v11 }
 0x152   : > { %v628_v29 = vmul.f32 %v1995_v25, %v623_v27 }
 0x154   : > { %v633_v30 = vadd.f32 %v1996_v28, %v628_v29 }
 0x156   : > { %v634_v31 = vpack.c.bf16 %v633_v30, %v633_v30 }
 0x158   : > { %1699 = vmatmul.msk.bf16.vlgmr.msra.gmra.mxu1 %vm594_vm0, %v634_v31 }
 0x1d5   : > { %v667_v33 = vpop.f32.mrf.mxu1 }
 0x1d6   : > { %v668_v34 = vadd.f32 %v1997_v32, %v667_v33 }
 0x1d8   : > { %675 = vrot.lane.b32.xlu2 %v668_v34, %s2325_s5  ;;  %700 = vrot.lane.b32.xlu1 %v668_v34, %s2874_s17  ;;  %v671_v35 = vmul.f32 0.35355338, %v668_v34  ;;  %s2898_s17 = smov 120  }
 0x1da   : > { %684 = vrot.lane.b32.xlu0 %v671_v35, %s2872_s12  ;;  %673 = vst.msk [vmem:[#allocation2] sm:$0xff] %vm672_vm5, %v671_v35  ;;  %s2899_s12 = smov 88  }
 0x1dd   : > { %v669_v36 = vpop.f32.mrf.mxu1 }
 0x1e0   : > { %688 = vrot.lane.b32.xlu2 %v668_v34, %s2871_s23  ;;  %712 = vrot.lane.b32.xlu1 %v668_v34, %s2329_s11  ;;  %s2900_s23 = smov 40  }
 0x1e1   : > { %v720_v57 = vld [vmem:[#allocation2] sm:$0xff] }
 0x1e2   : > { %679 = vrot.lane.b32.xlu0 %v668_v34, %s2864_s7  ;;  %s587_s7 = scalar_lea.vmem %s2845_s1, %s1852_s26  ;;  %s2897_s26 = smov 112  }
 0x1e3   : > { %v2608_v5 = vld [vmem:[%s587_s7] sm:$0xff]  ;;  %v2612_v10 = vld [vmem:[%s587_s7 + $0x8] sm:$0xff]  ;;  %v2616_v14 = vld [vmem:[%s587_s7 + $0x10] sm:$0xff] }
 0x1e4   : > { %v2620_v18 = vld [vmem:[%s587_s7 + $0x18] sm:$0xff]  ;;  %s2868_s7 = smov 16  }
 0x1e8   : > { %708 = vrot.lane.b32.xlu2 %v671_v35, %s2866_s13  ;;  %696 = vrot.lane.b32.xlu1 %v671_v35, %s2873_s21  ;;  %s2901_s21 = smov 48   ;;  %s2902_s13 = smov 104  }
 0x1ea   : > { %692 = vrot.lane.b32.xlu0 %v668_v34, %s2863_s27  ;;  %s2867_s27 = smov 24  }
 0x1f0   : > { %716 = vrot.lane.b32.xlu2 %v668_v34, %s2870_s22  ;;  %704 = vrot.lane.b32.xlu1 %v668_v34, %s2869_s28  ;;  %s2894_s28 = sld [smem:[#allocation28_spill]]  ;;  %s2896_s22 = smov 80  }
 0x232   : > { %v676_v37 = vpop.permute.xlu2 %675 }
 0x233   : > { %678 = vst.msk [vmem:[#allocation3] sm:$0xff] %vm672_vm5, %v676_v37 }
 0x23a   : > { %v689_v38 = vpop.permute.xlu2 %688  ;;  %v726_v52 = vld [vmem:[#allocation3] sm:$0xff] }
 0x23b   : > { %691 = vst.msk [vmem:[#allocation3 + $0x8] sm:$0xff] %vm672_vm5, %v689_v38 }
 0x242   : > { %v709_v39 = vpop.permute.xlu2 %708  ;;  %v727_v51 = vld [vmem:[#allocation3 + $0x8] sm:$0xff] }
 0x243   : > { %711 = vst.msk [vmem:[#allocation2 + $0x18] sm:$0xff] %vm672_vm5, %v709_v39  ;;  %v730_v53 = vpack.c.bf16 %v727_v51, %v726_v52 }
 0x245   : > { %v745_v55 = vsel %vm672_vm5, %v730_v53, 0 }
 0x24a   : > { %v701_v40 = vpop.permute.xlu1 %700  ;;  %v717_v41 = vpop.permute.xlu2 %716  ;;  %v723_v3 = vld [vmem:[#allocation2 + $0x18] sm:$0xff] }
 0x24b   : > { %703 = vst.msk [vmem:[#allocation3 + $0x10] sm:$0xff] %vm672_vm5, %v701_v40 }
 0x24c   : > { %719 = vst.msk [vmem:[#allocation4 + $0x18] sm:$0xff] %vm672_vm5, %v717_v41  ;;  %v685_v42 = vpop.permute.xlu0 %684 }
 0x24d   : > { %687 = vst.msk [vmem:[#allocation2 + $0x8] sm:$0xff] %vm672_vm5, %v685_v42 }
 0x252   : > { %v713_v43 = vpop.permute.xlu1 %712  ;;  %v728_v46 = vld [vmem:[#allocation3 + $0x10] sm:$0xff] }
 0x253   : > { %715 = vst.msk [vmem:[#allocation3 + $0x18] sm:$0xff] %vm672_vm5, %v713_v43  ;;  %v735_v59 = vld [vmem:[#allocation4 + $0x18] sm:$0xff] }
 0x254   : > { %v680_v44 = vpop.permute.xlu0 %679  ;;  %v721_v56 = vld [vmem:[#allocation2 + $0x8] sm:$0xff] }
 0x255   : > { %682 = vst.msk [vmem:[#allocation4] sm:$0xff] %vm672_vm5, %v680_v44  ;;  %v724_v60 = vpack.c.bf16 %v721_v56, %v720_v57 }
 0x25a   : > { %v697_v45 = vpop.permute.xlu1 %696  ;;  %v729_v47 = vld [vmem:[#allocation3 + $0x18] sm:$0xff] }
 0x25b   : > { %699 = vst.msk [vmem:[#allocation2 + $0x10] sm:$0xff] %vm672_vm5, %v697_v45  ;;  %v731_v48 = vpack.c.bf16 %v729_v47, %v728_v46 }
 0x25c   : > { %v693_v49 = vpop.permute.xlu0 %692  ;;  %v732_v63 = vld [vmem:[#allocation4] sm:$0xff] }
 0x25d   : > { %695 = vst.msk [vmem:[#allocation4 + $0x8] sm:$0xff] %vm672_vm5, %v693_v49  ;;  %v748_v50 = vsel %vm672_vm5, %v731_v48, 0 }
 0x25e   : > { %756 = vmatpush.bf16.xpose.msrb.mxu1 %v748_v50 }
 0x262   : > { %v705_v54 = vpop.permute.xlu1 %704  ;;  %v722_v2 = vld [vmem:[#allocation2 + $0x10] sm:$0xff] }
 0x263   : > { %707 = vst.msk [vmem:[#allocation4 + $0x10] sm:$0xff] %vm672_vm5, %v705_v54  ;;  %v725_v4 = vpack.c.bf16 %v723_v3, %v722_v2 }
 0x264   : > { %v733_v62 = vld [vmem:[#allocation4 + $0x8] sm:$0xff] }
 0x265   : > { %v736_v1 = vpack.c.bf16 %v733_v62, %v732_v63 }
 0x266   : > { %757 = vmatpush.bf16.xpose.msrb.mxu1 %v745_v55 }
 0x26a   : > { %v734_v58 = vld [vmem:[#allocation4 + $0x10] sm:$0xff] }
 0x26b   : > { %v737_v61 = vpack.c.bf16 %v735_v59, %v734_v58 }
 0x26d   : > { %1700 = vmatmul.msk.bf16.vlgmr.msrb.gmra.mxu1 %vm672_vm5, %v724_v60  ;;  %819 = vmatpush.bf16.msra.mxu2 %v737_v61  ;;  %v1856_v60 = vld [vmem:[%s2850_s6 + $0x8] sm:$0xff]  ;;  %v1855_v61 = vld [vmem:[%s2850_s6] sm:$0xff] }
 0x26e   : > { %890 = vmatpush.bf16.msra.mxu3 %v1856_v60 }
 0x271   : > { %820 = vmatpush.bf16.msra.mxu2 %v736_v1 }
 0x272   : > { %891 = vmatpush.bf16.msra.mxu3 %v1855_v61 }
 0x27d   : > { %1701 = vmatmul.msk.bf16.gmra.mxu1 %vm672_vm5, %v725_v4  ;;  %v1998_v4 = vld [vmem:[#allocation11] ss:$0 sm:$0xff] }
 0x2ea   : > { %v759_v6 = vpop.f32.mrf.mxu1 }
 0x2eb   : > { %v760_v7 = vadd.f32 %v759_v6, %v2608_v5 }
 0x2ed   : > { %v769_v9 = vsel %vm594_vm0, %v760_v7, -inf }
 0x2ee   : > { %770 = vmax.xlane.f32.xlu1 %v769_v9 }
 0x2f2   : > { %v761_v11 = vpop.f32.mrf.mxu1 }
 0x2f3   : > { %v762_v12 = vadd.f32 %v761_v11, %v2612_v10 }
 0x2f5   : > { %v772_v13 = vsel %vm594_vm0, %v762_v12, -inf }
 0x2f6   : > { %773 = vmax.xlane.f32.xlu2 %v772_v13 }
 0x2fa   : > { %v764_v15 = vpop.f32.mrf.mxu1 }
 0x2fb   : > { %v765_v16 = vadd.f32 %v764_v15, %v2616_v14 }
 0x2fd   : > { %v775_v17 = vsel %vm594_vm0, %v765_v16, -inf }
 0x2fe   : > { %776 = vmax.xlane.f32.xlu0 %v775_v17 }
 0x302   : > { %v766_v19 = vpop.f32.mrf.mxu1 }
 0x303   : > { %v767_v20 = vadd.f32 %v766_v19, %v2620_v18 }
 0x305   : > { %v778_v21 = vsel %vm594_vm0, %v767_v20, -inf }
 0x306   : > { %779 = vmax.xlane.f32.xlu2 %v778_v21  ;;  %v1866_v21 = vld [vmem:[%s2894_s28 + $0x38] sm:$0xff] }
 0x307   : > { %1045 = vmatpush.bf16.msrb.mxu2 %v1866_v21 }
 0x361   : > { %v771_v22 = vpop.xlane.xlu1 %770 }
 0x362   : > { %v781_v23 = vsub.f32 %v760_v7, %v771_v22 }
 0x364   : > { %v785_v24 = vmul.f32 1.442695, %v781_v23 }
 0x366   : > { %2015 = vpow2.f32 %v785_v24 }
 0x369   : > { %v774_v25 = vpop.xlane.xlu2 %773 }
 0x36a   : > { %v782_v26 = vsub.f32 %v762_v12, %v774_v25 }
 0x36c   : > { %v787_v27 = vmul.f32 1.442695, %v782_v26  ;;  %v2016_v30 = vpop.eup %2015 }
 0x36d   : > { %v793_v42 = vsel %vm594_vm0, %v2016_v30, 0.0 }
 0x36e   : > { %2017 = vpow2.f32 %v787_v27 }
 0x371   : > { %v777_v28 = vpop.xlane.xlu0 %776 }
 0x372   : > { %v783_v29 = vsub.f32 %v765_v16, %v777_v28 }
 0x374   : > { %v2018_v31 = vpop.eup %2017  ;;  %v789_v32 = vmul.f32 1.442695, %v783_v29 }
 0x375   : > { %v796_v33 = vsel %vm594_vm0, %v2018_v31, 0.0  ;;  %v805_v34 = vpack.c.bf16 %v2018_v31, %v2016_v30  ;;  %v1999_v31 = vld [vmem:[%s2895_s18] ss:$0 sm:$0xff] }
 0x376   : > { %2019 = vpow2.f32 %v789_v32  ;;  %797 = vadd.xlane.f32.xlu1 %v796_v33 }
 0x377   : > { %1702 = vmatmul.msk.bf16.vlgmr.msra.gmra.mxu2 %vm594_vm0, %v805_v34  ;;  %v2000_v34 = vld [vmem:[#allocation12] ss:$0 sm:$0xff] }
 0x379   : > { %v780_v35 = vpop.xlane.xlu2 %779 }
 0x37a   : > { %v784_v36 = vsub.f32 %v767_v20, %v780_v35  ;;  %v1858_v20 = vld [vmem:[%s2854_s10 + $0x8] sm:$0xff] }
 0x37b   : > { %960 = vmatpush.bf16.msra.mxu0 %v1858_v20 }
 0x37c   : > { %v2020_v37 = vpop.eup %2019  ;;  %v791_v38 = vmul.f32 1.442695, %v784_v36 }
 0x37d   : > { %v799_v39 = vsel %vm594_vm0, %v2020_v37, 0.0 }
 0x37e   : > { %2021 = vpow2.f32 %v791_v38  ;;  %800 = vadd.xlane.f32.xlu2 %v799_v39  ;;  %v1865_v38 = vld [vmem:[%s2894_s28 + $0x30] sm:$0xff]  ;;  %v1864_v39 = vld [vmem:[%s2894_s28 + $0x28] sm:$0xff] }
 0x37f   : > { %1046 = vmatpush.bf16.msrb.mxu2 %v1865_v38 }
 0x383   : > { %1047 = vmatpush.bf16.msrb.mxu2 %v1864_v39 }
 0x384   : > { %v2022_v40 = vpop.eup %2021 }
 0x385   : > { %v802_v41 = vsel %vm594_vm0, %v2022_v40, 0.0  ;;  %v806_v43 = vpack.c.bf16 %v2022_v40, %v2020_v37  ;;  %v1863_v40 = vld [vmem:[%s2894_s28 + $0x20] sm:$0xff] }
 0x386   : > { %803 = vadd.xlane.f32.xlu1 %v802_v41  ;;  %794 = vadd.xlane.f32.xlu2 %v793_v42  ;;  %v1862_v41 = vld [vmem:[%s2894_s28 + $0x18] sm:$0xff]  ;;  %v1861_v42 = vld [vmem:[%s2894_s28 + $0x10] sm:$0xff] }
 0x387   : > { %1703 = vmatmul.msk.bf16.gmra.mxu2 %vm594_vm0, %v806_v43  ;;  %v1860_v43 = vld [vmem:[%s2894_s28 + $0x8] sm:$0xff] }
 0x388   : > { %1048 = vmatpush.bf16.msrb.mxu2 %v1863_v40 }
 0x38c   : > { %1049 = vmatpush.bf16.msrb.mxu2 %v1862_v41 }
 0x390   : > { %1050 = vmatpush.bf16.msrb.mxu2 %v1861_v42 }
 0x394   : > { %1051 = vmatpush.bf16.msrb.mxu2 %v1860_v43 }
 0x3e9   : > { %v798_v45 = vpop.xlane.xlu1 %797 }
 0x3f1   : > { %v801_v44 = vpop.xlane.xlu2 %800 }
 0x3f9   : > { %v795_v46 = vpop.xlane.xlu2 %794  ;;  %v804_v53 = vpop.xlane.xlu1 %803 }
 0x3fa   : > { %2023 = vrcp.f32 %v795_v46  ;;  %v822_v47 = vpop.f32.mrf.mxu2 }
 0x3fb   : > { %2025 = vrcp.f32 %v798_v45  ;;  %v2001_v45 = vld [vmem:[#allocation14] ss:$0 sm:$0xff] }
 0x3fc   : > { %2027 = vrcp.f32 %v801_v44  ;;  %v1859_v44 = vld [vmem:[%s2894_s28] sm:$0xff] }
 0x3fd   : > { %2029 = vrcp.f32 %v804_v53  ;;  %1052 = vmatpush.bf16.msrb.mxu2 %v1859_v44 }
 0x400   : > { %v2024_v48 = vpop.eup %2023 }
 0x401   : > { %v836_v49 = vmul.f32 %v2024_v48, %v822_v47  ;;  %v2026_v50 = vpop.eup %2025 }
 0x402   : > { %v824_v51 = vpop.f32.mrf.mxu2  ;;  %v2028_v54 = vpop.eup %2027 }
 0x403   : > { %840 = vst.msk [vmem:[#allocation5] sm:$0xff] %vm672_vm5, %v836_v49  ;;  %v837_v52 = vmul.f32 %v2026_v50, %v824_v51  ;;  %v2030_v57 = vpop.eup %2029 }
 0x405   : > { %842 = vrot.lane.b32.xlu1 %v837_v52, %s2865_s25  ;;  %s2905_s25 = smov 8  }
 0x40a   : > { %v827_v55 = vpop.f32.mrf.mxu2 }
 0x40b   : > { %v838_v56 = vmul.f32 %v2028_v54, %v827_v55 }
 0x40d   : > { %848 = vrot.lane.b32.xlu0 %v838_v56, %s2868_s7  ;;  %s2906_s7 = smov 16  }
 0x412   : > { %v829_v58 = vpop.f32.mrf.mxu2 }
 0x413   : > { %v839_v59 = vmul.f32 %v2030_v57, %v829_v58 }
 0x415   : > { %854 = vrot.lane.b32.xlu2 %v839_v59, %s2867_s27  ;;  %v2002_v59 = vld [vmem:[#allocation15] ss:$0 sm:$0xff]  ;;  %s2907_s27 = smov 24  }
 0x46f   : > { %v855_v1 = vpop.permute.xlu2 %854 }
 0x477   : > { %v843_v62 = vpop.permute.xlu1 %842 }
 0x478   : > { %846 = vst.msk [vmem:[#allocation5] sm:$0xff] %vm845_vm6, %v843_v62 }
 0x47f   : > { %v849_v63 = vpop.permute.xlu0 %848 }
 0x480   : > { %852 = vst.msk [vmem:[#allocation5] sm:$0xff] %vm851_vm7, %v849_v63 }
 0x481   : > { %858 = vst.msk [vmem:[#allocation5] sm:$0xff] %vm857_vm8, %v855_v1 }
 0x488   : > { %v859_v2 = vld [vmem:[#allocation5] sm:$0xff] }
 0x489   : > { %v860_v3 = vpack.c.bf16 %v859_v2, %v859_v2 }
 0x48b   : > { %1712 = vmatmul.msk.bf16.vlgmr.msra.gmra.mxu3 %vm594_vm0, %v860_v3 }
 0x50e   : > { %v893_v6 = vpop.f32.mrf.mxu3 }
 0x50f   : > { %v894_v7 = vadd.f32 %v1998_v4, %v893_v6 }
 0x511   : > { %v2645_v9 = vadd.f32 %v894_v7, %v2553_v0  ;;  %v1857_v0 = vld [vmem:[%s2854_s10] sm:$0xff] }
 0x512   : > { %961 = vmatpush.bf16.msra.mxu0 %v1857_v0 }
 0x513   : > { %v898_v11 = vsel %vm594_vm0, %v2645_v9, 0.0 }
 0x514   : > { %899 = vadd.xlane.f32.xlu0 %v898_v11  ;;  %v1868_v11 = vld [vmem:[%s2848_s4 + $0x18] sm:$0xff] }
 0x515   : > { %1125 = vmatpush.bf16.msrb.mxu3 %v1868_v11 }
 0x516   : > { %v895_v12 = vpop.f32.mrf.mxu3 }
 0x587   : > { %v900_v13 = vpop.xlane.xlu0 %899 }
 0x588   : > { %v901_v15 = vmul.f32 %v900_v13, %v2557_v8 }
 0x58a   : > { %v902_v16 = vsub.f32 %v2645_v9, %v901_v15 }
 0x58c   : > { %v903_v17 = vmul.f32 %v902_v16, %v902_v16 }
 0x58e   : > { %v904_v19 = vsel %vm594_vm0, %v903_v17, 0.0 }
 0x58f   : > { %905 = vadd.xlane.f32.xlu1 %v904_v19 }
 0x602   : > { %v906_v22 = vpop.xlane.xlu1 %905 }
 0x603   : > { %v907_v23 = vmul.f32 %v906_v22, %v2557_v8  ;;  %v2003_v22 = vld [vmem:[%s2846_s2 + $0x1] ss:$0 sm:$0xff] }
 0x605   : > { %v908_v24 = vadd.f32 1e-05, %v907_v23 }
 0x607   : > { %2031 = vrsqrt.f32 %v908_v24  ;;  %vm915_vm10 = vweird.f32 %v908_v24 }
 0x60d   : > { %v2032_v25 = vpop.eup %2031 }
 0x60e   : > { %v910_v26 = vmul.f32 %v2032_v25, %v908_v24  ;;  %vm916_vm9 = vweird.f32 %v2032_v25 }
 0x60f   : > { %vm917_vm11 = vmor %vm915_vm10, %vm916_vm9 }
 0x610   : > { %v911_v27 = vmul.f32 %v2032_v25, %v910_v26 }
 0x612   : > { %v912_v28 = vmul.f32 0.5, %v911_v27 }
 0x614   : > { %v913_v29 = vsub.f32 1.5, %v912_v28 }
 0x616   : > { %v914_v30 = vmul.f32 %v2032_v25, %v913_v29  ;;  %v2005_v29 = vld [vmem:[#allocation9 + $0x1] ss:$0 sm:$0xff] }
 0x618   : > { %v918_v32 = vsel %vm917_vm11, %v2032_v25, %v914_v30  ;;  %v2004_v25 = vld [vmem:[%s2847_s3 + $0x1] ss:$0 sm:$0xff] }
 0x619   : > { %v919_v33 = vmul.f32 %v918_v32, %v902_v16 }
 0x61b   : > { %v924_v35 = vmul.f32 %v1999_v31, %v919_v33 }
 0x61d   : > { %v929_v36 = vadd.f32 %v2000_v34, %v924_v35 }
 0x61f   : > { %v930_v37 = vpack.c.bf16 %v929_v36, %v929_v36 }
 0x621   : > { %1721 = vmatmul.msk.bf16.vlgmr.msra.gmra.mxu0 %vm594_vm0, %v930_v37 }
 0x69e   : > { %v963_v46 = vpop.f32.mrf.mxu0 }
 0x69f   : > { %v964_v47 = vadd.f32 %v2001_v45, %v963_v46 }
 0x6a1   : > { %v967_v48 = vmul.f32 %v964_v47, %v964_v47 }
 0x6a3   : > { %v968_v49 = vmul.f32 %v967_v48, %v964_v47 }
 0x6a5   : > { %v969_v50 = vmul.f32 0.044715, %v968_v49 }
 0x6a6   : > { %v965_v51 = vpop.f32.mrf.mxu0 }
 0x6a7   : > { %v970_v52 = vadd.f32 %v969_v50, %v964_v47 }
 0x6a9   : > { %v971_v53 = vmul.f32 0.7978846, %v970_v52 }
 0x6ab   : > { %2033 = vtanh.f32 %v971_v53 }
 0x6b1   : > { %v2034_v54 = vpop.eup %2033 }
 0x6b2   : > { %v973_v55 = vadd.f32 1.0, %v2034_v54 }
 0x6b4   : > { %v974_v56 = vmul.f32 0.5, %v973_v55 }
 0x6b6   : > { %v975_v57 = vmul.f32 %v974_v56, %v964_v47 }
 0x6b8   : > { %v976_v58 = vpack.c.bf16 %v975_v57, %v975_v57 }
 0x6ba   : > { %1053 = vmatmul.bf16.vlgmr.msrb.gmra.mxu2 %v976_v58 }
 0x73d   : > { %v1054_v60 = vpop.f32.mrf.mxu2 }
 0x73e   : > { %v1055_v61 = vadd.f32 %v2002_v59, %v1054_v60 }
 0x740   : > { %v2688_v62 = vadd.f32 %v1055_v61, %v2645_v9  ;;  %v1867_v9 = vld [vmem:[%s2848_s4 + $0x10] sm:$0xff] }
 0x741   : > { %1126 = vmatpush.bf16.msrb.mxu3 %v1867_v9 }
 0x742   : > { %v1059_v63 = vsel %vm594_vm0, %v2688_v62, 0.0 }
 0x743   : > { %1060 = vadd.xlane.f32.xlu2 %v1059_v63 }
 0x745   : > { %v1056_v1 = vpop.f32.mrf.mxu2 }
 0x7b6   : > { %v1061_v2 = vpop.xlane.xlu2 %1060 }
 0x7b7   : > { %v1062_v3 = vmul.f32 %v1061_v2, %v2557_v8 }
 0x7b9   : > { %v1063_v4 = vsub.f32 %v2688_v62, %v1062_v3 }
 0x7bb   : > { %v1064_v6 = vmul.f32 %v1063_v4, %v1063_v4 }
 0x7bd   : > { %v1065_v7 = vsel %vm594_vm0, %v1064_v6, 0.0 }
 0x7be   : > { %1066 = vadd.xlane.f32.xlu0 %v1065_v7 }
 0x831   : > { %v1067_v12 = vpop.xlane.xlu0 %1066 }
 0x832   : > { %v1068_v13 = vmul.f32 %v1067_v12, %v2557_v8 }
 0x834   : > { %v1069_v15 = vadd.f32 1e-05, %v1068_v13 }
 0x836   : > { %2035 = vrsqrt.f32 %v1069_v15  ;;  %vm1076_vm13 = vweird.f32 %v1069_v15 }
 0x83c   : > { %v2036_v16 = vpop.eup %2035 }
 0x83d   : > { %v1071_v17 = vmul.f32 %v2036_v16, %v1069_v15  ;;  %vm1077_vm12 = vweird.f32 %v2036_v16 }
 0x83e   : > { %vm1078_vm14 = vmor %vm1076_vm13, %vm1077_vm12 }
 0x83f   : > { %v1072_v19 = vmul.f32 %v2036_v16, %v1071_v17 }
 0x841   : > { %v1073_v20 = vmul.f32 0.5, %v1072_v19 }
 0x843   : > { %v1074_v0 = vsub.f32 1.5, %v1073_v20 }
 0x845   : > { %v1075_v21 = vmul.f32 %v2036_v16, %v1074_v0 }
 0x847   : > { %v1079_v23 = vsel %vm1078_vm14, %v2036_v16, %v1075_v21 }
 0x848   : > { %v1080_v24 = vmul.f32 %v1079_v23, %v1063_v4 }
 0x84a   : > { %v1086_v26 = vmul.f32 %v2003_v22, %v1080_v24 }
 0x84c   : > { %v1092_v27 = vadd.f32 %v2004_v25, %v1086_v26 }
 0x84e   : > { %v1093_v28 = vpack.c.bf16 %v1092_v27, %v1092_v27 }
 0x850   : > { %1768 = vmatmul.msk.bf16.vlgmr.msrb.gmra.mxu3 %vm594_vm0, %v1093_v28 }
 0x8d3   : > { %v1128_v30 = vpop.f32.mrf.mxu3 }
 0x8d4   : > { %v1129_v31 = vadd.f32 %v2005_v29, %v1128_v30 }
 0x8d6   : > { %1135 = vrot.lane.b32.xlu0 %v1129_v31, %s2325_s5  ;;  %1172 = vrot.lane.b32.xlu2 %v1129_v31, %s2329_s11  ;;  %v1132_v32 = vmul.f32 0.35355338, %v1129_v31  ;;  %s2903_s5 = smov 64   ;;  %s2904_s11 = smov 56  }
 0x8d7   : > { %1160 = vrot.lane.b32.xlu1 %v1129_v31, %s2896_s22 }
 0x8d8   : > { %1133 = vst.msk [vmem:[#allocation2] sm:$0xff] %vm672_vm5, %v1132_v32 }
 0x8db   : > { %v1130_v33 = vpop.f32.mrf.mxu3 }
 0x8de   : > { %1156 = vrot.lane.b32.xlu2 %v1132_v32, %s2897_s26  ;;  %1144 = vrot.lane.b32.xlu0 %v1132_v32, %s2898_s17  ;;  %s1849_s17 = sshll.u32 %s2438_s20, 3 }
 0x8df   : > { %1148 = vrot.lane.b32.xlu1 %v1129_v31, %s2899_s12  ;;  %v1180_v56 = vld [vmem:[#allocation2] sm:$0xff] }
 0x8e6   : > { %1176 = vrot.lane.b32.xlu2 %v1129_v31, %s2900_s23  ;;  %1164 = vrot.lane.b32.xlu0 %v1129_v31, %s2901_s21  ;;  %s2908_s21 = sld [smem:[#allocation30_spill]] }
 0x8e7   : > { %1168 = vrot.lane.b32.xlu1 %v1132_v32, %s2902_s13 }
 0x8ec   : > { %s1536_s13 = scalar_lea.hbm %s2908_s21, %s1849_s17  ;;  %s2257_s12 = scalar_lea.hbm %s2908_s21, 16 }
 0x8ee   : > { %1139 = vrot.lane.b32.xlu2 %v1129_v31, %s2903_s5  ;;  %s2909_s5 = sshll.u32 %s2531_s14, 3 }
 0x8f6   : > { %1152 = vrot.lane.b32.xlu2 %v1129_v31, %s2904_s11  ;;  %s582_s11 = scalar_lea.vmem [#allocation17], %s2909_s5 }
 0x930   : > { %v1173_v34 = vpop.permute.xlu2 %1172 }
 0x931   : > { %1175 = vst.msk [vmem:[#allocation3 + $0x18] sm:$0xff] %vm672_vm5, %v1173_v34 }
 0x938   : > { %v1157_v35 = vpop.permute.xlu2 %1156  ;;  %v1189_v44 = vld [vmem:[#allocation3 + $0x18] sm:$0xff] }
 0x939   : > { %1159 = vst.msk [vmem:[#allocation2 + $0x10] sm:$0xff] %vm672_vm5, %v1157_v35 }
 0x940   : > { %v1177_v36 = vpop.permute.xlu2 %1176  ;;  %v1182_v1 = vld [vmem:[#allocation2 + $0x10] sm:$0xff] }
 0x941   : > { %1179 = vst.msk [vmem:[#allocation4 + $0x18] sm:$0xff] %vm672_vm5, %v1177_v36 }
 0x948   : > { %v1136_v37 = vpop.permute.xlu0 %1135  ;;  %v1140_v38 = vpop.permute.xlu2 %1139  ;;  %v1195_v55 = vld [vmem:[#allocation4 + $0x18] sm:$0xff] }
 0x949   : > { %1138 = vst.msk [vmem:[#allocation3] sm:$0xff] %vm672_vm5, %v1136_v37  ;;  %v1161_v39 = vpop.permute.xlu1 %1160 }
 0x94a   : > { %1163 = vst.msk [vmem:[#allocation3 + $0x10] sm:$0xff] %vm672_vm5, %v1161_v39 }
 0x94b   : > { %1142 = vst.msk [vmem:[#allocation4] sm:$0xff] %vm672_vm5, %v1140_v38 }
 0x950   : > { %v1153_v40 = vpop.permute.xlu2 %1152  ;;  %v1145_v41 = vpop.permute.xlu0 %1144  ;;  %v1186_v49 = vld [vmem:[#allocation3] sm:$0xff] }
 0x951   : > { %v1149_v42 = vpop.permute.xlu1 %1148  ;;  %1155 = vst.msk [vmem:[#allocation4 + $0x8] sm:$0xff] %vm672_vm5, %v1153_v40  ;;  %v1188_v43 = vld [vmem:[#allocation3 + $0x10] sm:$0xff] }
 0x952   : > { %1151 = vst.msk [vmem:[#allocation3 + $0x8] sm:$0xff] %vm672_vm5, %v1149_v42  ;;  %v1191_v45 = vpack.c.bf16 %v1189_v44, %v1188_v43  ;;  %v1192_v60 = vld [vmem:[#allocation4] sm:$0xff] }
 0x953   : > { %1147 = vst.msk [vmem:[#allocation2 + $0x8] sm:$0xff] %vm672_vm5, %v1145_v41 }
 0x954   : > { %v1208_v46 = vsel %vm672_vm5, %v1191_v45, 0 }
 0x955   : > { %1216 = vmatpush.bf16.xpose.msrb.mxu0 %v1208_v46 }
 0x958   : > { %v1165_v47 = vpop.permute.xlu0 %1164  ;;  %v1193_v59 = vld [vmem:[#allocation4 + $0x8] sm:$0xff] }
 0x959   : > { %v1169_v48 = vpop.permute.xlu1 %1168  ;;  %1167 = vst.msk [vmem:[#allocation4 + $0x10] sm:$0xff] %vm672_vm5, %v1165_v47  ;;  %v1187_v50 = vld [vmem:[#allocation3 + $0x8] sm:$0xff]  ;;  %v1196_v61 = vpack.c.bf16 %v1193_v59, %v1192_v60  ;;  %v2006_v60 = vld [vmem:[#allocation11 + $0x1] ss:$0 sm:$0xff] }
 0x95a   : > { %1171 = vst.msk [vmem:[#allocation2 + $0x18] sm:$0xff] %vm672_vm5, %v1169_v48  ;;  %v1190_v51 = vpack.c.bf16 %v1187_v50, %v1186_v49  ;;  %v1181_v53 = vld [vmem:[#allocation2 + $0x8] sm:$0xff] }
 0x95b   : > { %v1184_v58 = vpack.c.bf16 %v1181_v53, %v1180_v56  ;;  %v1870_v53 = vld [vmem:[%s2850_s6 + $0x18] sm:$0xff] }
 0x95c   : > { %v1205_v52 = vsel %vm672_vm5, %v1190_v51, 0  ;;  %1349 = vmatpush.bf16.msra.mxu1 %v1870_v53 }
 0x95d   : > { %1217 = vmatpush.bf16.xpose.msrb.mxu0 %v1205_v52 }
 0x960   : > { %v1194_v54 = vld [vmem:[#allocation4 + $0x10] sm:$0xff] }
 0x961   : > { %v1197_v57 = vpack.c.bf16 %v1195_v55, %v1194_v54  ;;  %v1183_v63 = vld [vmem:[#allocation2 + $0x18] sm:$0xff]  ;;  %v1869_v54 = vld [vmem:[%s2850_s6 + $0x10] sm:$0xff] }
 0x962   : > { %v1185_v2 = vpack.c.bf16 %v1183_v63, %v1182_v1  ;;  %1350 = vmatpush.bf16.msra.mxu1 %v1869_v54 }
 0x963   : > { %1279 = vmatpush.bf16.msra.mxu3 %v1197_v57 }
 0x964   : > { %1769 = vmatmul.msk.bf16.vlgmr.msrb.gmra.mxu0 %vm672_vm5, %v1184_v58 }
 0x967   : > { %1280 = vmatpush.bf16.msra.mxu3 %v1196_v61 }
 0x974   : > { %1770 = vmatmul.msk.bf16.gmra.mxu0 %vm672_vm5, %v1185_v2 }
 0x9e1   : > { %v1219_v3 = vpop.f32.mrf.mxu0 }
 0x9e2   : > { %v1220_v4 = vadd.f32 %v1219_v3, %v2608_v5 }
 0x9e4   : > { %v1229_v6 = vsel %vm594_vm0, %v1220_v4, -inf }
 0x9e5   : > { %1230 = vmax.xlane.f32.xlu1 %v1229_v6 }
 0x9e9   : > { %v1221_v7 = vpop.f32.mrf.mxu0 }
 0x9ea   : > { %v1222_v11 = vadd.f32 %v1221_v7, %v2612_v10 }
 0x9ec   : > { %v1232_v9 = vsel %vm594_vm0, %v1222_v11, -inf }
 0x9ed   : > { %1233 = vmax.xlane.f32.xlu0 %v1232_v9 }
 0x9f1   : > { %v1224_v12 = vpop.f32.mrf.mxu0 }
 0x9f2   : > { %v1225_v13 = vadd.f32 %v1224_v12, %v2616_v14  ;;  %v1872_v12 = vld [vmem:[%s2854_s10 + $0x18] sm:$0xff] }
 0x9f3   : > { %1423 = vmatpush.bf16.msra.mxu2 %v1872_v12 }
 0x9f4   : > { %v1235_v15 = vsel %vm594_vm0, %v1225_v13, -inf }
 0x9f5   : > { %1236 = vmax.xlane.f32.xlu2 %v1235_v15 }
 0x9f9   : > { %v1226_v16 = vpop.f32.mrf.mxu0 }
 0x9fa   : > { %v1227_v17 = vadd.f32 %v1226_v16, %v2620_v18 }
 0x9fc   : > { %v1238_v5 = vsel %vm594_vm0, %v1227_v17, -inf }
 0x9fd   : > { %1239 = vmax.xlane.f32.xlu1 %v1238_v5 }
 0xa58   : > { %v1231_v19 = vpop.xlane.xlu1 %1230 }
 0xa59   : > { %v1241_v20 = vsub.f32 %v1220_v4, %v1231_v19 }
 0xa5b   : > { %v1245_v0 = vmul.f32 1.442695, %v1241_v20 }
 0xa5d   : > { %2037 = vpow2.f32 %v1245_v0 }
 0xa60   : > { %v1234_v21 = vpop.xlane.xlu0 %1233 }
 0xa61   : > { %v1242_v10 = vsub.f32 %v1222_v11, %v1234_v21 }
 0xa63   : > { %v1247_v22 = vmul.f32 1.442695, %v1242_v10  ;;  %v2038_v14 = vpop.eup %2037 }
 0xa64   : > { %v1253_v34 = vsel %vm594_vm0, %v2038_v14, 0.0 }
 0xa65   : > { %2039 = vpow2.f32 %v1247_v22  ;;  %v2007_v22 = vld [vmem:[%s2895_s18 + $0x1] ss:$0 sm:$0xff] }
 0xa68   : > { %v1237_v23 = vpop.xlane.xlu2 %1236 }
 0xa69   : > { %v1243_v24 = vsub.f32 %v1225_v13, %v1237_v23  ;;  %v1880_v13 = vld [vmem:[%s2894_s28 + $0x78] sm:$0xff] }
 0xa6a   : > { %1510 = vmatpush.bf16.msra.mxu0 %v1880_v13 }
 0xa6b   : > { %v2040_v25 = vpop.eup %2039  ;;  %v1249_v26 = vmul.f32 1.442695, %v1243_v24 }
 0xa6c   : > { %v1265_v27 = vpack.c.bf16 %v2040_v25, %v2038_v14  ;;  %v1256_v28 = vsel %vm594_vm0, %v2040_v25, 0.0  ;;  %v2008_v14 = vld [vmem:[#allocation12 + $0x1] ss:$0 sm:$0xff] }
 0xa6d   : > { %2041 = vpow2.f32 %v1249_v26  ;;  %1257 = vadd.xlane.f32.xlu0 %v1256_v28  ;;  %v1878_v28 = vld [vmem:[%s2894_s28 + $0x68] sm:$0xff] }
 0xa6e   : > { %1771 = vmatmul.msk.bf16.vlgmr.msra.gmra.mxu3 %vm594_vm0, %v1265_v27  ;;  %v1879_v27 = vld [vmem:[%s2894_s28 + $0x70] sm:$0xff] }
 0xa6f   : > { %1511 = vmatpush.bf16.msra.mxu0 %v1879_v27 }
 0xa70   : > { %v1240_v18 = vpop.xlane.xlu1 %1239 }
 0xa71   : > { %v1244_v29 = vsub.f32 %v1227_v17, %v1240_v18  ;;  %v1877_v18 = vld [vmem:[%s2894_s28 + $0x60] sm:$0xff] }
 0xa73   : > { %v2042_v30 = vpop.eup %2041  ;;  %v1251_v31 = vmul.f32 1.442695, %v1244_v29  ;;  %1512 = vmatpush.bf16.msra.mxu0 %v1878_v28  ;;  %v1876_v29 = vld [vmem:[%s2894_s28 + $0x58] sm:$0xff] }
 0xa74   : > { %v1259_v32 = vsel %vm594_vm0, %v2042_v30, 0.0 }
 0xa75   : > { %2043 = vpow2.f32 %v1251_v31  ;;  %1260 = vadd.xlane.f32.xlu1 %v1259_v32  ;;  %v1874_v31 = vld [vmem:[%s2894_s28 + $0x48] sm:$0xff]  ;;  %v1873_v32 = vld [vmem:[%s2894_s28 + $0x40] sm:$0xff] }
 0xa77   : > { %1513 = vmatpush.bf16.msra.mxu0 %v1877_v18 }
 0xa7b   : > { %v2044_v33 = vpop.eup %2043  ;;  %1514 = vmatpush.bf16.msra.mxu0 %v1876_v29 }
 0xa7c   : > { %v1262_v35 = vsel %vm594_vm0, %v2044_v33, 0.0  ;;  %v1266_v36 = vpack.c.bf16 %v2044_v33, %v2042_v30  ;;  %v1875_v30 = vld [vmem:[%s2894_s28 + $0x50] sm:$0xff]  ;;  %v2009_v33 = vld [vmem:[#allocation14 + $0x1] ss:$0 sm:$0xff] }
 0xa7d   : > { %1254 = vadd.xlane.f32.xlu1 %v1253_v34  ;;  %1263 = vadd.xlane.f32.xlu0 %v1262_v35 }
 0xa7e   : > { %1772 = vmatmul.msk.bf16.gmra.mxu3 %vm594_vm0, %v1266_v36 }
 0xa7f   : > { %1515 = vmatpush.bf16.msra.mxu0 %v1875_v30 }
 0xa83   : > { %1516 = vmatpush.bf16.msra.mxu0 %v1874_v31 }
 0xa87   : > { %1517 = vmatpush.bf16.msra.mxu0 %v1873_v32 }
 0xae0   : > { %v1258_v38 = vpop.xlane.xlu0 %1257 }
 0xae8   : > { %v1261_v37 = vpop.xlane.xlu1 %1260 }
 0xaf0   : > { %v1255_v39 = vpop.xlane.xlu1 %1254  ;;  %v1264_v46 = vpop.xlane.xlu0 %1263 }
 0xaf1   : > { %v1282_v40 = vpop.f32.mrf.mxu3  ;;  %2045 = vrcp.f32 %v1255_v39 }
 0xaf2   : > { %2047 = vrcp.f32 %v1258_v38 }
 0xaf3   : > { %2049 = vrcp.f32 %v1261_v37 }
 0xaf4   : > { %2051 = vrcp.f32 %v1264_v46 }
 0xaf7   : > { %v2046_v41 = vpop.eup %2045 }
 0xaf8   : > { %v2048_v42 = vpop.eup %2047  ;;  %v1296_v43 = vmul.f32 %v2046_v41, %v1282_v40 }
 0xaf9   : > { %v1284_v44 = vpop.f32.mrf.mxu3  ;;  %v2050_v47 = vpop.eup %2049 }
 0xafa   : > { %v1297_v45 = vmul.f32 %v2048_v42, %v1284_v44  ;;  %1300 = vst.msk [vmem:[#allocation5] sm:$0xff] %vm672_vm5, %v1296_v43  ;;  %v2052_v50 = vpop.eup %2051 }
 0xafc   : > { %1302 = vrot.lane.b32.xlu0 %v1297_v45, %s2905_s25  ;;  %s1538_s25 = sshll.u32 %s582_s11, 4  ;;  %s1539_s25 = int_to_ptr.vmem [resolvable:$true] %s1538_s25 }
 0xb01   : > { %v1287_v48 = vpop.f32.mrf.mxu3 }
 0xb02   : > { %v1298_v49 = vmul.f32 %v2050_v47, %v1287_v48  ;;  %v2010_v47 = vld [vmem:[#allocation15 + $0x1] ss:$0 sm:$0xff] }
 0xb04   : > { %1307 = vrot.lane.b32.xlu2 %v1298_v49, %s2906_s7  ;;  %s1540_s7 = sshll.u32 %s1536_s13, 4  ;;  %s1541_s7 = int_to_ptr.hbm [resolvable:$true] %s1540_s7 }
 0xb05   : > { %s2251_s20 = sshra.s32 %s1541_s7, 4  ;;  %s2252_s20 = int_to_ptr.hbm [resolvable:$true] %s2251_s20 }
 0xb06   : > { %s2253_s22 = scalar_lea.hbm %s2252_s20, 8  ;;  %p2258_p8 = scmp.lt.s32.totalorder %s2252_s20, %s2908_s21 }
 0xb07   : > { %p2254_p3 = scmp.ne.s32.totalorder %s2252_s20, %s2253_s22  ;;  %p2259_p7 = scmp.lt.s32.totalorder %s2257_s12, %s2253_s22 }
 0xb09   : > { %v1289_v51 = vpop.f32.mrf.mxu3  ;;  %p2255_p5 = pnand %p2254_p3, %p2500_p13  ;;  %p2260_p9 = por %p2259_p7, %p2258_p8 }
 0xb0a   : > { %v1299_v52 = vmul.f32 %v2052_v50, %v1289_v51 }
 0xb0b   : > { %p2256_p12 = pneg %p2255_p5 }
 0xb0c   : > { %1312 = vrot.lane.b32.xlu1 %v1299_v52, %s2907_s27  ;;  %s1526_s27 = scalar_lea.sflag [#allocation8], %s2531_s14 }
 0xb0d   : > { %p2261_p10 = pnand %p2260_p9, %p2256_p12 }
 0xb5e   : > { %v1308_v56 = vpop.permute.xlu2 %1307 }
 0xb6e   : > { %v1303_v55 = vpop.permute.xlu0 %1302 }
 0xb6f   : > { %1305 = vst.msk [vmem:[#allocation5] sm:$0xff] %vm845_vm6, %v1303_v55 }
 0xb70   : > { %1310 = vst.msk [vmem:[#allocation5] sm:$0xff] %vm851_vm7, %v1308_v56 }
 0xb7e   : > { %v1313_v57 = vpop.permute.xlu1 %1312 }
 0xb7f   : > { %1315 = vst.msk [vmem:[#allocation5] sm:$0xff] %vm857_vm8, %v1313_v57 }
 0xb86   : > { %v1316_v58 = vld [vmem:[#allocation5] sm:$0xff] }
 0xb87   : > { %v1317_v59 = vpack.c.bf16 %v1316_v58, %v1316_v58 }
 0xb89   : > { %1785 = vmatmul.msk.bf16.vlgmr.msra.gmra.mxu1 %vm594_vm0, %v1317_v59 }
 0xc06   : > { %v1352_v61 = vpop.f32.mrf.mxu1 }
 0xc07   : > { %v1353_v63 = vadd.f32 %v2006_v60, %v1352_v61 }
 0xc09   : > { %v2765_v1 = vadd.f32 %v1353_v63, %v2688_v62  ;;  %v1871_v62 = vld [vmem:[%s2854_s10 + $0x10] sm:$0xff] }
 0xc0a   : > { %1424 = vmatpush.bf16.msra.mxu2 %v1871_v62 }
 0xc0b   : > { %v1357_v2 = vsel %vm594_vm0, %v2765_v1, 0.0 }
 0xc0c   : > { %1358 = vadd.xlane.f32.xlu0 %v1357_v2 }
 0xc0e   : > { %v1354_v3 = vpop.f32.mrf.mxu1 }
 0xc7f   : > { %v1359_v4 = vpop.xlane.xlu0 %1358 }
 0xc80   : > { %v1360_v6 = vmul.f32 %v1359_v4, %v2557_v8 }
 0xc82   : > { %v1361_v7 = vsub.f32 %v2765_v1, %v1360_v6 }
 0xc84   : > { %v1362_v11 = vmul.f32 %v1361_v7, %v1361_v7 }
 0xc86   : > { %v1363_v9 = vsel %vm594_vm0, %v1362_v11, 0.0 }
 0xc87   : > { %1364 = vadd.xlane.f32.xlu2 %v1363_v9 }
 0xcfa   : > { %v1365_v15 = vpop.xlane.xlu2 %1364 }
 0xcfb   : > { %v1366_v16 = vmul.f32 %v1365_v15, %v2557_v8 }
 0xcfd   : > { %v1367_v17 = vadd.f32 1e-05, %v1366_v16 }
 0xcff   : > { %2053 = vrsqrt.f32 %v1367_v17  ;;  %vm1374_vm1 = vweird.f32 %v1367_v17 }
 0xd05   : > { %v2054_v5 = vpop.eup %2053 }
 0xd06   : > { %v1369_v19 = vmul.f32 %v2054_v5, %v1367_v17  ;;  %vm1375_vm15 = vweird.f32 %v2054_v5 }
 0xd07   : > { %vm1376_vm2 = vmor %vm1374_vm1, %vm1375_vm15 }
 0xd08   : > { %v1370_v20 = vmul.f32 %v2054_v5, %v1369_v19 }
 0xd0a   : > { %v1371_v0 = vmul.f32 0.5, %v1370_v20 }
 0xd0c   : > { %v1372_v21 = vsub.f32 1.5, %v1371_v0 }
 0xd0e   : > { %v1373_v10 = vmul.f32 %v2054_v5, %v1372_v21 }
 0xd10   : > { %v1377_v23 = vsel %vm1376_vm2, %v2054_v5, %v1373_v10 }
 0xd11   : > { %v1378_v24 = vmul.f32 %v1377_v23, %v1361_v7 }
 0xd13   : > { %v1384_v8 = vmul.f32 %v2007_v22, %v1378_v24 }
 0xd15   : > { %v1390_v25 = vadd.f32 %v2008_v14, %v1384_v8 }
 0xd17   : > { %v1391_v26 = vpack.c.bf16 %v1390_v25, %v1390_v25 }
 0xd19   : > { %1799 = vmatmul.msk.bf16.vlgmr.msra.gmra.mxu2 %vm594_vm0, %v1391_v26 }
 0xd9c   : > { %v1426_v34 = vpop.f32.mrf.mxu2 }
 0xd9d   : > { %v1427_v35 = vadd.f32 %v2009_v33, %v1426_v34 }
 0xd9f   : > { %v1430_v36 = vmul.f32 %v1427_v35, %v1427_v35 }
 0xda1   : > { %v1431_v37 = vmul.f32 %v1430_v36, %v1427_v35 }
 0xda3   : > { %v1432_v38 = vmul.f32 0.044715, %v1431_v37 }
 0xda4   : > { %v1428_v39 = vpop.f32.mrf.mxu2 }
 0xda5   : > { %v1433_v40 = vadd.f32 %v1432_v38, %v1427_v35 }
 0xda7   : > { %v1434_v41 = vmul.f32 0.7978846, %v1433_v40 }
 0xda9   : > { %2055 = vtanh.f32 %v1434_v41 }
 0xdaf   : > { %v2056_v42 = vpop.eup %2055 }
 0xdb0   : > { %v1436_v43 = vadd.f32 1.0, %v2056_v42 }
 0xdb2   : > { %v1437_v44 = vmul.f32 0.5, %v1436_v43 }
 0xdb4   : > { %v1438_v45 = vmul.f32 %v1437_v44, %v1427_v35 }
 0xdb6   : > { %v1439_v46 = vpack.c.bf16 %v1438_v45, %v1438_v45 }
 0xdb8   : > { %1518 = vmatmul.bf16.vlgmr.msra.gmra.mxu0 %v1439_v46 }
 0xe35   : > { %v1519_v48 = vpop.f32.mrf.mxu0 }
 0xe36   : > { %v1520_v49 = vadd.f32 %v2010_v47, %v1519_v48 }
 0xe38   : > { %v1523_v50 = vadd.f32 %v1520_v49, %v2765_v1 }
 0xe3a   : > { %1524 = vst.msk [vmem:[%s582_s11] sm:$0xff] %vm594_vm0, %v1523_v50 }
 0xe3b   : > { %2264 = shalt.err (!%p2261_p10)
}
 0xe3c   : > { %1903 = dma.vmem_to_hbm [thread:$0]  (%p2500_p13), %s1539_s25, 128, %s1541_s7, %s1526_s27  }
 0xe3d   : > { %v1521_v51 = vpop.f32.mrf.mxu0 }
 0xe3e PF: > { %s1552_s14 = sand.u32 1, %s2303_s29   ;;  %p2910_p11 = scmp.ge.s32.totalorder %s2315_s16, 2 }
 0xe3f   : > { %s1553_s5 = scalar_lea.sflag [#allocation8], %s1552_s14 }
 0xe40   : > { %p1926_p0 = pnand %p2910_p11, %p2505_p4 }
 0xe42   : > { %p1927_p2 = pneg %p1926_p0 }
 0xe44   : > { %2298 = dma.done.wait (%p1927_p2), %s1553_s5, 128  }
 0xe45   : > { %2300 = vsyncadd (%p1927_p2), %s1553_s5, 4294967168  ;;  %p30_p6 = scmp.ge.s32.totalorder %s2480_s24, 4   ;;  %s2911_s29 = smov %s2307_s30 }
 0xe46   : > { %s2912_s30 = smov %s2311_s15  ;;  %s2913_s15 = smov %s2492_s9 }
 0xe47   : > { %s2914_s16 = smov %s2480_s24  ;;  %32 = sbr.rel (!%p30_p6) target bundleno = 17 (0x11), region = 156 }
 0xe4c   :  { %1559 = vsyncpa [#allocation7], 1 }
 0xe4d   :  { %1561 = vsyncpa [#allocation7 + $0x1], 1 }
 0xe4e   :  { %1562 = vsyncpa [#allocation10], 1 }
 0xe4f   :  { %1563 = vsyncpa [#allocation13], 1 }
 0xe50   :  { %1564 = vsyncpa [#allocation16], 1 }
 0xe51   :  { %1565 = vsyncpa [#allocation8], 1 }
 0xe52   :  { %1567 = vsyncpa [#allocation8 + $0x1], 1 }

</bundles_post_ra>
